<compile_context>
chip_gen: v5e
topology: v5e:2x2
jax: 0.10.0
libtpu: 0.0.40
codegen_flags: <defaults>
</compile_context>

<pallas_src>
import numpy as np
import jax
import jax.numpy as jnp
from jax.experimental import pallas as pl
from jax.experimental.pallas import tpu as pltpu

EPS = 1e-5                      # PyTorch BatchNorm default eps
H_IN, W_IN, C_IN = 16, 16, 2    # 16x16x2 input -> 64ch x 2 x 2 = 256-dim feature
H1_PAD, H2_PAD = 256, 128       # classifier hidden dims padded to lane multiples


# ---------------------------------------------------------------------------
# Fused forward kernel (one batch element per grid step)
# ---------------------------------------------------------------------------

def fused_kernel(x_ref,
                 t1a, t1b, c1b,
                 t2a, t2b, c2b,
                 ev1a, ev1b, sh1a, sh1b,
                 t3a, t3b, t3c, c3b,
                 ev2a, ev2b, sh2a, sh2b,
                 w1a, w1b, b1,
                 w2, b2,
                 w3, b3,
                 o_ref):
    def mm(a, b_):
        return jnp.dot(a, b_, preferred_element_type=jnp.float32)

    x = x_ref[0]                                              # [16, 32]  (h, w*2+c)

    # Conv2d(2, 4, 2)  via row-tap Toeplitz matmuls          -> [15, 60]
    y1 = mm(x[0:15, :], t1a[...]) + mm(x[1:16, :], t1b[...]) + c1b[...]
    # Conv2d(4, 16, 2)                                       -> [14, 224]
    y2 = mm(y1[0:14, :], t2a[...]) + mm(y1[1:15, :], t2b[...]) + c2b[...]
    # MaxPool2d(2, 2) -> ReLU                                -> [7, 112]
    v1 = jnp.maximum(mm(ev1a[...], y2), mm(ev1b[...], y2))    # vertical max
    p1 = jnp.maximum(mm(v1, sh1a[...]), mm(v1, sh1b[...]))    # horizontal max
    r1 = jnp.maximum(p1, 0.0)                                 # BatchNorm2d(16) folded into conv3
    # Conv2d(16, 64, 3) (+ folded bn1)                       -> [5, 320]
    y3 = (mm(r1[0:5, :], t3a[...]) + mm(r1[1:6, :], t3b[...])
          + mm(r1[2:7, :], t3c[...]) + c3b[...])
    # MaxPool2d(2, 2) -> ReLU                                -> [2, 128]
    v2 = jnp.maximum(mm(ev2a[...], y3), mm(ev2b[...], y3))
    p2 = jnp.maximum(mm(v2, sh2a[...]), mm(v2, sh2b[...]))
    r2 = jnp.maximum(p2, 0.0)                                 # BatchNorm2d(64) folded into fc1

    # Classifier: Linear -> (Dropout = identity, eval) -> ReLU -> BN1d(folded)
    #             -> Linear -> ReLU -> BN1d(folded) -> Linear -> Softmax
    h1 = jnp.maximum(
        mm(r2[0:1, :], w1a[...]) + mm(r2[1:2, :], w1b[...]) + b1[...], 0.0)   # [1, 256]
    h2 = jnp.maximum(mm(h1, w2[...]) + b2[...], 0.0)                          # [1, 128]
    logits = mm(h2, w3[...]) + b3[...]                                        # [1, 2]

    z = logits - jnp.max(logits, axis=-1, keepdims=True)
    e = jnp.exp(z)
    o_ref[0] = e / jnp.sum(e, axis=-1, keepdims=True)


# ---------------------------------------------------------------------------
# One-time parameter prep (numpy): BN folding + Toeplitz / pool-selector build
# ---------------------------------------------------------------------------

def _np(a):
    return np.asarray(a, dtype=np.float32)


def _bn_fold(g, b, m, v):
    s = _np(g) / np.sqrt(_np(v) + EPS)
    return s, _np(b) - _np(m) * s


def _toeplitz_taps(w_oihw, w_in):
    """Per-kernel-row Toeplitz matrices for a valid stride-1 conv on a
    [H, W*IC] channels-in-lanes layout: T_i[w*IC+ic, ow*OC+oc] = W[oc,ic,i,w-ow]."""
    oc, ic, kh, kw = w_oihw.shape
    ow_n = w_in - kw + 1
    taps = []
    for i in range(kh):
        t = np.zeros((w_in * ic, ow_n * oc), np.float32)
        for ow in range(ow_n):
            for j in range(kw):
                w = ow + j
                t[w * ic:(w + 1) * ic, ow * oc:(ow + 1) * oc] = w_oihw[:, :, i, j].T
        taps.append(t)
    return taps


def _pool_selectors(h_in, w_in, c):
    """Constant 0/1 matrices for 2x2/stride-2 max-pool corner selection:
    vertical (left-multiply) and horizontal (right-multiply)."""
    oh, ow = h_in // 2, w_in // 2
    ev = []
    for i in range(2):
        e = np.zeros((oh, h_in), np.float32)
        e[np.arange(oh), 2 * np.arange(oh) + i] = 1.0
        ev.append(e)
    sh = []
    eye = np.eye(c, dtype=np.float32)
    for j in range(2):
        s = np.zeros((w_in * c, ow * c), np.float32)
        for wo in range(ow):
            wi = 2 * wo + j
            s[wi * c:(wi + 1) * c, wo * c:(wo + 1) * c] = eye
        sh.append(s)
    return ev, sh


def prepare_params(p):
    # --- features ---
    t1 = _toeplitz_taps(_np(p["conv1_w"]), W_IN)             # 2 x [32, 60]
    bias1 = np.tile(_np(p["conv1_b"]), W_IN - 1)             # [60]

    t2 = _toeplitz_taps(_np(p["conv2_w"]), W_IN - 1)         # 2 x [60, 224]
    bias2 = np.tile(_np(p["conv2_b"]), W_IN - 2)             # [224]

    pv1, ph1 = _pool_selectors(14, 14, 16)                   # [7,14] x2, [224,112] x2

    bs1, bd1 = _bn_fold(p["bn1_g"], p["bn1_b"], p["bn1_m"], p["bn1_v"])      # [16]
    bs1_row, bd1_row = np.tile(bs1, 7), np.tile(bd1, 7)      # [112]
    t3 = _toeplitz_taps(_np(p["conv3_w"]), 7)                # 3 x [112, 320]
    bias3 = np.tile(_np(p["conv3_b"]), 5) + sum(bd1_row @ t for t in t3)     # fold bn1 shift
    t3 = [bs1_row[:, None] * t for t in t3]                  # fold bn1 scale

    pv2, ph2 = _pool_selectors(5, 5, 64)                     # [2,5] x2, [320,128] x2

    # --- classifier: fold bn2 -> fc1, cbn1 -> fc2, cbn2 -> fc3 ---
    bs2, bd2 = _bn_fold(p["bn2_g"], p["bn2_b"], p["bn2_m"], p["bn2_v"])      # [64]
    fw1, fb1 = _np(p["fc1_w"]), _np(p["fc1_b"])              # [170, 256], [170]
    w1r = fw1.reshape(170, 64, 2, 2)                         # [o, c, h, w] (NCHW flatten)
    w1h = np.transpose(w1r, (2, 3, 1, 0)) * bs2[None, None, :, None]         # [h, w, c, o]
    w1h = w1h.reshape(2, 2 * 64, 170)                        # [h, w*64+c, o]
    b1f = fb1 + np.einsum("c,ochw->o", bd2, w1r)

    w1a = np.zeros((128, H1_PAD), np.float32); w1a[:, :170] = w1h[0]
    w1b = np.zeros((128, H1_PAD), np.float32); w1b[:, :170] = w1h[1]
    b1p = np.zeros((H1_PAD,), np.float32);     b1p[:170] = b1f

    cs1, cd1 = _bn_fold(p["cbn1_g"], p["cbn1_b"], p["cbn1_m"], p["cbn1_v"])  # [170]
    fw2, fb2 = _np(p["fc2_w"]), _np(p["fc2_b"])              # [90, 170], [90]
    w2f = cs1[:, None] * fw2.T                               # [170, 90]
    b2f = fb2 + cd1 @ fw2.T
    w2p = np.zeros((H1_PAD, H2_PAD), np.float32); w2p[:170, :90] = w2f
    b2p = np.zeros((H2_PAD,), np.float32);        b2p[:90] = b2f

    cs2, cd2 = _bn_fold(p["cbn2_g"], p["cbn2_b"], p["cbn2_m"], p["cbn2_v"])  # [90]
    fw3, fb3 = _np(p["fc3_w"]), _np(p["fc3_b"])              # [2, 90], [2]
    w3f = cs2[:, None] * fw3.T                               # [90, 2]
    b3f = fb3 + cd2 @ fw3.T
    w3p = np.zeros((H2_PAD, 2), np.float32); w3p[:90, :] = w3f

    def row(v):
        return np.asarray(v, np.float32).reshape(1, -1)

    consts = [
        t1[0], t1[1], row(bias1),
        t2[0], t2[1], row(bias2),
        pv1[0], pv1[1], ph1[0], ph1[1],
        t3[0], t3[1], t3[2], row(bias3),
        pv2[0], pv2[1], ph2[0], ph2[1],
        w1a, w1b, row(b1p),
        w2p, row(b2p),
        w3p, row(b3f),
    ]
    return [jnp.asarray(c) for c in consts]


# ---------------------------------------------------------------------------
# Wrapper: single pallas_call over the batch grid
# ---------------------------------------------------------------------------

def basenet_forward(x_nchw, consts):
    """x_nchw: [B, 2, 16, 16] (PyTorch layout).  Returns [B, 2] softmax rows."""
    b, c, h, w = x_nchw.shape
    x2 = jnp.transpose(x_nchw.astype(jnp.float32), (0, 2, 3, 1)).reshape(b, h, w * c)

    in_specs = [pl.BlockSpec((1, h, w * c), lambda i: (i, 0, 0))]
    in_specs += [pl.BlockSpec(a.shape, lambda i: (0, 0)) for a in consts]

    out = pl.pallas_call(
        fused_kernel,
        out_shape=jax.ShapeDtypeStruct((b, 1, 2), jnp.float32),
        grid=(b,),
        in_specs=in_specs,
        out_specs=pl.BlockSpec((1, 1, 2), lambda i: (i, 0, 0)),
        compiler_params=pltpu.CompilerParams(dimension_semantics=("parallel",)),
    )(x2, *consts)
    return out.reshape(b, 2)


# ---------------------------------------------------------------------------
# Pure-JAX reference (mirror of the PyTorch eval forward) + deterministic init
# ---------------------------------------------------------------------------

def reference_forward(x, p):
    x = x.astype(jnp.float32)

    def conv(h, w, b):
        y = jax.lax.conv_general_dilated(
            h, w, window_strides=(1, 1), padding="VALID",
            dimension_numbers=("NCHW", "OIHW", "NCHW"))
        return y + b[None, :, None, None]

    def pool(h):
        return jax.lax.reduce_window(h, -jnp.inf, jax.lax.max,
                                     (1, 1, 2, 2), (1, 1, 2, 2), "VALID")

    def bn2d(h, g, b, m, v):
        s = g * jax.lax.rsqrt(v + EPS)
        return h * s[None, :, None, None] + (b - m * s)[None, :, None, None]

    def bn1d(h, g, b, m, v):
        s = g * jax.lax.rsqrt(v + EPS)
        return h * s + (b - m * s)

    h = conv(x, p["conv1_w"], p["conv1_b"])
    h = conv(h, p["conv2_w"], p["conv2_b"])
    h = bn2d(jnp.maximum(pool(h), 0.0), p["bn1_g"], p["bn1_b"], p["bn1_m"], p["bn1_v"])
    h = conv(h, p["conv3_w"], p["conv3_b"])
    h = bn2d(jnp.maximum(pool(h), 0.0), p["bn2_g"], p["bn2_b"], p["bn2_m"], p["bn2_v"])
    f = h.reshape(h.shape[0], -1)

    h1 = bn1d(jnp.maximum(f @ p["fc1_w"].T + p["fc1_b"], 0.0),
              p["cbn1_g"], p["cbn1_b"], p["cbn1_m"], p["cbn1_v"])
    h2 = bn1d(jnp.maximum(h1 @ p["fc2_w"].T + p["fc2_b"], 0.0),
              p["cbn2_g"], p["cbn2_b"], p["cbn2_m"], p["cbn2_v"])
    logits = h2 @ p["fc3_w"].T + p["fc3_b"]
    return jax.nn.softmax(logits, axis=1)


def init_params(key):
    ks = iter(jax.random.split(key, 32))

    def nrm(shape, scale=0.1):
        return scale * jax.random.normal(next(ks), shape, dtype=jnp.float32)

    def bn(c):
        return (1.0 + nrm((c,)), nrm((c,)), nrm((c,)), 1.0 + jnp.abs(nrm((c,))))

    b1g, b1b, b1m, b1v = bn(16)
    b2g, b2b, b2m, b2v = bn(64)
    c1g, c1b, c1m, c1v = bn(170)
    c2g, c2b, c2m, c2v = bn(90)
    return {
        "conv1_w": nrm((4, 2, 2, 2)),   "conv1_b": nrm((4,)),
        "conv2_w": nrm((16, 4, 2, 2)),  "conv2_b": nrm((16,)),
        "bn1_g": b1g, "bn1_b": b1b, "bn1_m": b1m, "bn1_v": b1v,
        "conv3_w": nrm((64, 16, 3, 3)), "conv3_b": nrm((64,)),
        "bn2_g": b2g, "bn2_b": b2b, "bn2_m": b2m, "bn2_v": b2v,
        # Linear weights in PyTorch layout [out, in].
        "fc1_w": nrm((170, 256)), "fc1_b": nrm((170,)),
        "cbn1_g": c1g, "cbn1_b": c1b, "cbn1_m": c1m, "cbn1_v": c1v,
        "fc2_w": nrm((90, 170)),  "fc2_b": nrm((90,)),
        "cbn2_g": c2g, "cbn2_b": c2b, "cbn2_m": c2m, "cbn2_v": c2v,
        "fc3_w": nrm((2, 90)),    "fc3_b": nrm((2,)),
    }


if __name__ == "__main__":
    key = jax.random.PRNGKey(0)
    k_x, k_p = jax.random.split(key)
    # 16x16 spatial with 2 channels -> 64ch x 2 x 2 = 256-dim flattened feature.
    x = jax.random.normal(k_x, (2, C_IN, H_IN, W_IN), dtype=jnp.float32)
    params = init_params(k_p)
    consts = prepare_params(params)   # one-time: BN folding + Toeplitz / pool matrices

    out = jax.jit(basenet_forward)(x, consts)
    out = jax.block_until_ready(out)

    ref = jax.block_until_ready(jax.jit(reference_forward)(x, params))

    assert out.shape == (2, 2)
    assert bool(jnp.all(jnp.isfinite(out)))
    # rows are softmax distributions
    assert bool(jnp.allclose(jnp.sum(out, axis=1), 1.0, atol=1e-5))
    # matches the (unfused, unfolded) reference forward pass
    assert bool(jnp.allclose(out, ref, atol=1e-2, rtol=1e-2))
    print("KERNEL_OK")
</pallas_src>

<mosaic_0001>
module attributes {stable_mosaic.version = 11 : i64} {
  func.func @fused_kernel(%arg0: i32, %arg1: memref<1x16x32xf32, #tpu.memory_space<vmem>>, %arg2: memref<32x60xf32, #tpu.memory_space<vmem>>, %arg3: memref<32x60xf32, #tpu.memory_space<vmem>>, %arg4: memref<1x60xf32, #tpu.memory_space<vmem>>, %arg5: memref<60x224xf32, #tpu.memory_space<vmem>>, %arg6: memref<60x224xf32, #tpu.memory_space<vmem>>, %arg7: memref<1x224xf32, #tpu.memory_space<vmem>>, %arg8: memref<7x14xf32, #tpu.memory_space<vmem>>, %arg9: memref<7x14xf32, #tpu.memory_space<vmem>>, %arg10: memref<224x112xf32, #tpu.memory_space<vmem>>, %arg11: memref<224x112xf32, #tpu.memory_space<vmem>>, %arg12: memref<112x320xf32, #tpu.memory_space<vmem>>, %arg13: memref<112x320xf32, #tpu.memory_space<vmem>>, %arg14: memref<112x320xf32, #tpu.memory_space<vmem>>, %arg15: memref<1x320xf32, #tpu.memory_space<vmem>>, %arg16: memref<2x5xf32, #tpu.memory_space<vmem>>, %arg17: memref<2x5xf32, #tpu.memory_space<vmem>>, %arg18: memref<320x128xf32, #tpu.memory_space<vmem>>, %arg19: memref<320x128xf32, #tpu.memory_space<vmem>>, %arg20: memref<128x256xf32, #tpu.memory_space<vmem>>, %arg21: memref<128x256xf32, #tpu.memory_space<vmem>>, %arg22: memref<1x256xf32, #tpu.memory_space<vmem>>, %arg23: memref<256x128xf32, #tpu.memory_space<vmem>>, %arg24: memref<1x128xf32, #tpu.memory_space<vmem>>, %arg25: memref<128x2xf32, #tpu.memory_space<vmem>>, %arg26: memref<1x2xf32, #tpu.memory_space<vmem>>, %arg27: memref<1x1x2xf32, #tpu.memory_space<vmem>>) attributes {dimension_semantics = [#tpu.dimension_semantics<parallel>], iteration_bounds = array<i64: 2>, scalar_prefetch = 0 : i64, scratch_operands = 0 : i64, tpu.core_type = #tpu.core_type<tc>, window_params = [{transform_indices = @transform_0, window_bounds = array<i64: 1, 16, 32>}, {pipeline_mode = #tpu.pipeline_mode<synchronous>, transform_indices = @transform_1, window_bounds = array<i64: 32, 60>}, {pipeline_mode = #tpu.pipeline_mode<synchronous>, transform_indices = @transform_2, window_bounds = array<i64: 32, 60>}, {pipeline_mode = #tpu.pipeline_mode<synchronous>, transform_indices = @transform_3, window_bounds = array<i64: 1, 60>}, {pipeline_mode = #tpu.pipeline_mode<synchronous>, transform_indices = @transform_4, window_bounds = array<i64: 60, 224>}, {pipeline_mode = #tpu.pipeline_mode<synchronous>, transform_indices = @transform_5, window_bounds = array<i64: 60, 224>}, {pipeline_mode = #tpu.pipeline_mode<synchronous>, transform_indices = @transform_6, window_bounds = array<i64: 1, 224>}, {pipeline_mode = #tpu.pipeline_mode<synchronous>, transform_indices = @transform_7, window_bounds = array<i64: 7, 14>}, {pipeline_mode = #tpu.pipeline_mode<synchronous>, transform_indices = @transform_8, window_bounds = array<i64: 7, 14>}, {pipeline_mode = #tpu.pipeline_mode<synchronous>, transform_indices = @transform_9, window_bounds = array<i64: 224, 112>}, {pipeline_mode = #tpu.pipeline_mode<synchronous>, transform_indices = @transform_10, window_bounds = array<i64: 224, 112>}, {pipeline_mode = #tpu.pipeline_mode<synchronous>, transform_indices = @transform_11, window_bounds = array<i64: 112, 320>}, {pipeline_mode = #tpu.pipeline_mode<synchronous>, transform_indices = @transform_12, window_bounds = array<i64: 112, 320>}, {pipeline_mode = #tpu.pipeline_mode<synchronous>, transform_indices = @transform_13, window_bounds = array<i64: 112, 320>}, {pipeline_mode = #tpu.pipeline_mode<synchronous>, transform_indices = @transform_14, window_bounds = array<i64: 1, 320>}, {pipeline_mode = #tpu.pipeline_mode<synchronous>, transform_indices = @transform_15, window_bounds = array<i64: 2, 5>}, {pipeline_mode = #tpu.pipeline_mode<synchronous>, transform_indices = @transform_16, window_bounds = array<i64: 2, 5>}, {pipeline_mode = #tpu.pipeline_mode<synchronous>, transform_indices = @transform_17, window_bounds = array<i64: 320, 128>}, {pipeline_mode = #tpu.pipeline_mode<synchronous>, transform_indices = @transform_18, window_bounds = array<i64: 320, 128>}, {pipeline_mode = #tpu.pipeline_mode<synchronous>, transform_indices = @transform_19, window_bounds = array<i64: 128, 256>}, {pipeline_mode = #tpu.pipeline_mode<synchronous>, transform_indices = @transform_20, window_bounds = array<i64: 128, 256>}, {pipeline_mode = #tpu.pipeline_mode<synchronous>, transform_indices = @transform_21, window_bounds = array<i64: 1, 256>}, {pipeline_mode = #tpu.pipeline_mode<synchronous>, transform_indices = @transform_22, window_bounds = array<i64: 256, 128>}, {pipeline_mode = #tpu.pipeline_mode<synchronous>, transform_indices = @transform_23, window_bounds = array<i64: 1, 128>}, {pipeline_mode = #tpu.pipeline_mode<synchronous>, transform_indices = @transform_24, window_bounds = array<i64: 128, 2>}, {pipeline_mode = #tpu.pipeline_mode<synchronous>, transform_indices = @transform_25, window_bounds = array<i64: 1, 2>}, {transform_indices = @transform_26, window_bounds = array<i64: 1, 1, 2>}]} {
    %c0 = arith.constant 0 : index
    %c0_0 = arith.constant 0 : index
    %c0_1 = arith.constant 0 : index
    %0 = vector.load %arg1[%c0, %c0_0, %c0_1] : memref<1x16x32xf32, #tpu.memory_space<vmem>>, vector<1x16x32xf32>
    %1 = vector.shape_cast %0 : vector<1x16x32xf32> to vector<16x32xf32>
    %2 = vector.extract_strided_slice %1 {offsets = [0, 0], sizes = [15, 32], strides = [1, 1]} : vector<16x32xf32> to vector<15x32xf32>
    %c0_2 = arith.constant 0 : index
    %c0_3 = arith.constant 0 : index
    %3 = vector.load %arg2[%c0_2, %c0_3] : memref<32x60xf32, #tpu.memory_space<vmem>>, vector<32x60xf32>
    %cst = arith.constant dense<0.000000e+00> : vector<15x60xf32>
    %4 = tpu.matmul %2, %3, %cst {dimension_numbers = #tpu.dot_dimension_numbers<[1], [0], [0], [1], [0, 0, 1, 1], [], []>} : vector<15x32xf32>, vector<32x60xf32>, vector<15x60xf32> -> vector<15x60xf32>
    %5 = vector.extract_strided_slice %1 {offsets = [1, 0], sizes = [15, 32], strides = [1, 1]} : vector<16x32xf32> to vector<15x32xf32>
    %c0_4 = arith.constant 0 : index
    %c0_5 = arith.constant 0 : index
    %6 = vector.load %arg3[%c0_4, %c0_5] : memref<32x60xf32, #tpu.memory_space<vmem>>, vector<32x60xf32>
    %cst_6 = arith.constant dense<0.000000e+00> : vector<15x60xf32>
    %7 = tpu.matmul %5, %6, %cst_6 {dimension_numbers = #tpu.dot_dimension_numbers<[1], [0], [0], [1], [0, 0, 1, 1], [], []>} : vector<15x32xf32>, vector<32x60xf32>, vector<15x60xf32> -> vector<15x60xf32>
    %8 = arith.addf %4, %7 : vector<15x60xf32>
    %c0_7 = arith.constant 0 : index
    %c0_8 = arith.constant 0 : index
    %9 = vector.load %arg4[%c0_7, %c0_8] : memref<1x60xf32, #tpu.memory_space<vmem>>, vector<1x60xf32>
    %10 = vector.broadcast %9 : vector<1x60xf32> to vector<15x60xf32>
    %11 = arith.addf %8, %10 : vector<15x60xf32>
    %12 = vector.extract_strided_slice %11 {offsets = [0, 0], sizes = [14, 60], strides = [1, 1]} : vector<15x60xf32> to vector<14x60xf32>
    %c0_9 = arith.constant 0 : index
    %c0_10 = arith.constant 0 : index
    %13 = vector.load %arg5[%c0_9, %c0_10] : memref<60x224xf32, #tpu.memory_space<vmem>>, vector<60x224xf32>
    %cst_11 = arith.constant dense<0.000000e+00> : vector<14x224xf32>
    %14 = tpu.matmul %12, %13, %cst_11 {dimension_numbers = #tpu.dot_dimension_numbers<[1], [0], [0], [1], [0, 0, 1, 1], [], []>} : vector<14x60xf32>, vector<60x224xf32>, vector<14x224xf32> -> vector<14x224xf32>
    %15 = vector.extract_strided_slice %11 {offsets = [1, 0], sizes = [14, 60], strides = [1, 1]} : vector<15x60xf32> to vector<14x60xf32>
    %c0_12 = arith.constant 0 : index
    %c0_13 = arith.constant 0 : index
    %16 = vector.load %arg6[%c0_12, %c0_13] : memref<60x224xf32, #tpu.memory_space<vmem>>, vector<60x224xf32>
    %cst_14 = arith.constant dense<0.000000e+00> : vector<14x224xf32>
    %17 = tpu.matmul %15, %16, %cst_14 {dimension_numbers = #tpu.dot_dimension_numbers<[1], [0], [0], [1], [0, 0, 1, 1], [], []>} : vector<14x60xf32>, vector<60x224xf32>, vector<14x224xf32> -> vector<14x224xf32>
    %18 = arith.addf %14, %17 : vector<14x224xf32>
    %c0_15 = arith.constant 0 : index
    %c0_16 = arith.constant 0 : index
    %19 = vector.load %arg7[%c0_15, %c0_16] : memref<1x224xf32, #tpu.memory_space<vmem>>, vector<1x224xf32>
    %20 = vector.broadcast %19 : vector<1x224xf32> to vector<14x224xf32>
    %21 = arith.addf %18, %20 : vector<14x224xf32>
    %c0_17 = arith.constant 0 : index
    %c0_18 = arith.constant 0 : index
    %22 = vector.load %arg8[%c0_17, %c0_18] : memref<7x14xf32, #tpu.memory_space<vmem>>, vector<7x14xf32>
    %cst_19 = arith.constant dense<0.000000e+00> : vector<7x224xf32>
    %23 = tpu.matmul %22, %21, %cst_19 {dimension_numbers = #tpu.dot_dimension_numbers<[1], [0], [0], [1], [0, 0, 1, 1], [], []>} : vector<7x14xf32>, vector<14x224xf32>, vector<7x224xf32> -> vector<7x224xf32>
    %c0_20 = arith.constant 0 : index
    %c0_21 = arith.constant 0 : index
    %24 = vector.load %arg9[%c0_20, %c0_21] : memref<7x14xf32, #tpu.memory_space<vmem>>, vector<7x14xf32>
    %cst_22 = arith.constant dense<0.000000e+00> : vector<7x224xf32>
    %25 = tpu.matmul %24, %21, %cst_22 {dimension_numbers = #tpu.dot_dimension_numbers<[1], [0], [0], [1], [0, 0, 1, 1], [], []>} : vector<7x14xf32>, vector<14x224xf32>, vector<7x224xf32> -> vector<7x224xf32>
    %26 = arith.maximumf %23, %25 : vector<7x224xf32>
    %c0_23 = arith.constant 0 : index
    %c0_24 = arith.constant 0 : index
    %27 = vector.load %arg10[%c0_23, %c0_24] : memref<224x112xf32, #tpu.memory_space<vmem>>, vector<224x112xf32>
    %cst_25 = arith.constant dense<0.000000e+00> : vector<7x112xf32>
    %28 = tpu.matmul %26, %27, %cst_25 {dimension_numbers = #tpu.dot_dimension_numbers<[1], [0], [0], [1], [0, 0, 1, 1], [], []>} : vector<7x224xf32>, vector<224x112xf32>, vector<7x112xf32> -> vector<7x112xf32>
    %c0_26 = arith.constant 0 : index
    %c0_27 = arith.constant 0 : index
    %29 = vector.load %arg11[%c0_26, %c0_27] : memref<224x112xf32, #tpu.memory_space<vmem>>, vector<224x112xf32>
    %cst_28 = arith.constant dense<0.000000e+00> : vector<7x112xf32>
    %30 = tpu.matmul %26, %29, %cst_28 {dimension_numbers = #tpu.dot_dimension_numbers<[1], [0], [0], [1], [0, 0, 1, 1], [], []>} : vector<7x224xf32>, vector<224x112xf32>, vector<7x112xf32> -> vector<7x112xf32>
    %31 = arith.maximumf %28, %30 : vector<7x112xf32>
    %cst_29 = arith.constant 0.000000e+00 : f32
    %32 = vector.broadcast %cst_29 : f32 to vector<7x112xf32>
    %33 = arith.maximumf %31, %32 : vector<7x112xf32>
    %34 = vector.extract_strided_slice %33 {offsets = [0, 0], sizes = [5, 112], strides = [1, 1]} : vector<7x112xf32> to vector<5x112xf32>
    %c0_30 = arith.constant 0 : index
    %c0_31 = arith.constant 0 : index
    %35 = vector.load %arg12[%c0_30, %c0_31] : memref<112x320xf32, #tpu.memory_space<vmem>>, vector<112x320xf32>
    %cst_32 = arith.constant dense<0.000000e+00> : vector<5x320xf32>
    %36 = tpu.matmul %34, %35, %cst_32 {dimension_numbers = #tpu.dot_dimension_numbers<[1], [0], [0], [1], [0, 0, 1, 1], [], []>} : vector<5x112xf32>, vector<112x320xf32>, vector<5x320xf32> -> vector<5x320xf32>
    %37 = vector.extract_strided_slice %33 {offsets = [1, 0], sizes = [5, 112], strides = [1, 1]} : vector<7x112xf32> to vector<5x112xf32>
    %c0_33 = arith.constant 0 : index
    %c0_34 = arith.constant 0 : index
    %38 = vector.load %arg13[%c0_33, %c0_34] : memref<112x320xf32, #tpu.memory_space<vmem>>, vector<112x320xf32>
    %cst_35 = arith.constant dense<0.000000e+00> : vector<5x320xf32>
    %39 = tpu.matmul %37, %38, %cst_35 {dimension_numbers = #tpu.dot_dimension_numbers<[1], [0], [0], [1], [0, 0, 1, 1], [], []>} : vector<5x112xf32>, vector<112x320xf32>, vector<5x320xf32> -> vector<5x320xf32>
    %40 = arith.addf %36, %39 : vector<5x320xf32>
    %41 = vector.extract_strided_slice %33 {offsets = [2, 0], sizes = [5, 112], strides = [1, 1]} : vector<7x112xf32> to vector<5x112xf32>
    %c0_36 = arith.constant 0 : index
    %c0_37 = arith.constant 0 : index
    %42 = vector.load %arg14[%c0_36, %c0_37] : memref<112x320xf32, #tpu.memory_space<vmem>>, vector<112x320xf32>
    %cst_38 = arith.constant dense<0.000000e+00> : vector<5x320xf32>
    %43 = tpu.matmul %41, %42, %cst_38 {dimension_numbers = #tpu.dot_dimension_numbers<[1], [0], [0], [1], [0, 0, 1, 1], [], []>} : vector<5x112xf32>, vector<112x320xf32>, vector<5x320xf32> -> vector<5x320xf32>
    %44 = arith.addf %40, %43 : vector<5x320xf32>
    %c0_39 = arith.constant 0 : index
    %c0_40 = arith.constant 0 : index
    %45 = vector.load %arg15[%c0_39, %c0_40] : memref<1x320xf32, #tpu.memory_space<vmem>>, vector<1x320xf32>
    %46 = vector.broadcast %45 : vector<1x320xf32> to vector<5x320xf32>
    %47 = arith.addf %44, %46 : vector<5x320xf32>
    %c0_41 = arith.constant 0 : index
    %c0_42 = arith.constant 0 : index
    %48 = vector.load %arg16[%c0_41, %c0_42] : memref<2x5xf32, #tpu.memory_space<vmem>>, vector<2x5xf32>
    %cst_43 = arith.constant dense<0.000000e+00> : vector<2x320xf32>
    %49 = tpu.matmul %48, %47, %cst_43 {dimension_numbers = #tpu.dot_dimension_numbers<[1], [0], [0], [1], [0, 0, 1, 1], [], []>} : vector<2x5xf32>, vector<5x320xf32>, vector<2x320xf32> -> vector<2x320xf32>
    %c0_44 = arith.constant 0 : index
    %c0_45 = arith.constant 0 : index
    %50 = vector.load %arg17[%c0_44, %c0_45] : memref<2x5xf32, #tpu.memory_space<vmem>>, vector<2x5xf32>
    %cst_46 = arith.constant dense<0.000000e+00> : vector<2x320xf32>
    %51 = tpu.matmul %50, %47, %cst_46 {dimension_numbers = #tpu.dot_dimension_numbers<[1], [0], [0], [1], [0, 0, 1, 1], [], []>} : vector<2x5xf32>, vector<5x320xf32>, vector<2x320xf32> -> vector<2x320xf32>
    %52 = arith.maximumf %49, %51 : vector<2x320xf32>
    %c0_47 = arith.constant 0 : index
    %c0_48 = arith.constant 0 : index
    %53 = vector.load %arg18[%c0_47, %c0_48] : memref<320x128xf32, #tpu.memory_space<vmem>>, vector<320x128xf32>
    %cst_49 = arith.constant dense<0.000000e+00> : vector<2x128xf32>
    %54 = tpu.matmul %52, %53, %cst_49 {dimension_numbers = #tpu.dot_dimension_numbers<[1], [0], [0], [1], [0, 0, 1, 1], [], []>} : vector<2x320xf32>, vector<320x128xf32>, vector<2x128xf32> -> vector<2x128xf32>
    %c0_50 = arith.constant 0 : index
    %c0_51 = arith.constant 0 : index
    %55 = vector.load %arg19[%c0_50, %c0_51] : memref<320x128xf32, #tpu.memory_space<vmem>>, vector<320x128xf32>
    %cst_52 = arith.constant dense<0.000000e+00> : vector<2x128xf32>
    %56 = tpu.matmul %52, %55, %cst_52 {dimension_numbers = #tpu.dot_dimension_numbers<[1], [0], [0], [1], [0, 0, 1, 1], [], []>} : vector<2x320xf32>, vector<320x128xf32>, vector<2x128xf32> -> vector<2x128xf32>
    %57 = arith.maximumf %54, %56 : vector<2x128xf32>
    %cst_53 = arith.constant 0.000000e+00 : f32
    %58 = vector.broadcast %cst_53 : f32 to vector<2x128xf32>
    %59 = arith.maximumf %57, %58 : vector<2x128xf32>
    %60 = vector.extract_strided_slice %59 {offsets = [0, 0], sizes = [1, 128], strides = [1, 1]} : vector<2x128xf32> to vector<1x128xf32>
    %c0_54 = arith.constant 0 : index
    %c0_55 = arith.constant 0 : index
    %61 = vector.load %arg20[%c0_54, %c0_55] : memref<128x256xf32, #tpu.memory_space<vmem>>, vector<128x256xf32>
    %cst_56 = arith.constant dense<0.000000e+00> : vector<1x256xf32>
    %62 = tpu.matmul %60, %61, %cst_56 {dimension_numbers = #tpu.dot_dimension_numbers<[1], [0], [0], [1], [0, 0, 1, 1], [], []>} : vector<1x128xf32>, vector<128x256xf32>, vector<1x256xf32> -> vector<1x256xf32>
    %63 = vector.extract_strided_slice %59 {offsets = [1, 0], sizes = [1, 128], strides = [1, 1]} : vector<2x128xf32> to vector<1x128xf32>
    %c0_57 = arith.constant 0 : index
    %c0_58 = arith.constant 0 : index
    %64 = vector.load %arg21[%c0_57, %c0_58] : memref<128x256xf32, #tpu.memory_space<vmem>>, vector<128x256xf32>
    %cst_59 = arith.constant dense<0.000000e+00> : vector<1x256xf32>
    %65 = tpu.matmul %63, %64, %cst_59 {dimension_numbers = #tpu.dot_dimension_numbers<[1], [0], [0], [1], [0, 0, 1, 1], [], []>} : vector<1x128xf32>, vector<128x256xf32>, vector<1x256xf32> -> vector<1x256xf32>
    %66 = arith.addf %62, %65 : vector<1x256xf32>
    %c0_60 = arith.constant 0 : index
    %c0_61 = arith.constant 0 : index
    %67 = vector.load %arg22[%c0_60, %c0_61] : memref<1x256xf32, #tpu.memory_space<vmem>>, vector<1x256xf32>
    %68 = arith.addf %66, %67 : vector<1x256xf32>
    %cst_62 = arith.constant 0.000000e+00 : f32
    %69 = vector.broadcast %cst_62 : f32 to vector<1x256xf32>
    %70 = arith.maximumf %68, %69 : vector<1x256xf32>
    %c0_63 = arith.constant 0 : index
    %c0_64 = arith.constant 0 : index
    %71 = vector.load %arg23[%c0_63, %c0_64] : memref<256x128xf32, #tpu.memory_space<vmem>>, vector<256x128xf32>
    %cst_65 = arith.constant dense<0.000000e+00> : vector<1x128xf32>
    %72 = tpu.matmul %70, %71, %cst_65 {dimension_numbers = #tpu.dot_dimension_numbers<[1], [0], [0], [1], [0, 0, 1, 1], [], []>} : vector<1x256xf32>, vector<256x128xf32>, vector<1x128xf32> -> vector<1x128xf32>
    %c0_66 = arith.constant 0 : index
    %c0_67 = arith.constant 0 : index
    %73 = vector.load %arg24[%c0_66, %c0_67] : memref<1x128xf32, #tpu.memory_space<vmem>>, vector<1x128xf32>
    %74 = arith.addf %72, %73 : vector<1x128xf32>
    %cst_68 = arith.constant 0.000000e+00 : f32
    %75 = vector.broadcast %cst_68 : f32 to vector<1x128xf32>
    %76 = arith.maximumf %74, %75 : vector<1x128xf32>
    %c0_69 = arith.constant 0 : index
    %c0_70 = arith.constant 0 : index
    %77 = vector.load %arg25[%c0_69, %c0_70] : memref<128x2xf32, #tpu.memory_space<vmem>>, vector<128x2xf32>
    %cst_71 = arith.constant dense<0.000000e+00> : vector<1x2xf32>
    %78 = tpu.matmul %76, %77, %cst_71 {dimension_numbers = #tpu.dot_dimension_numbers<[1], [0], [0], [1], [0, 0, 1, 1], [], []>} : vector<1x128xf32>, vector<128x2xf32>, vector<1x2xf32> -> vector<1x2xf32>
    %c0_72 = arith.constant 0 : index
    %c0_73 = arith.constant 0 : index
    %79 = vector.load %arg26[%c0_72, %c0_73] : memref<1x2xf32, #tpu.memory_space<vmem>>, vector<1x2xf32>
    %80 = arith.addf %78, %79 : vector<1x2xf32>
    %cst_74 = arith.constant dense<0xFF800000> : vector<1xf32>
    %81 = vector.multi_reduction <maximumf>, %80, %cst_74 [1] : vector<1x2xf32> to vector<1xf32>
    %82 = vector.shape_cast %81 : vector<1xf32> to vector<1x1xf32>
    %83 = vector.broadcast %82 : vector<1x1xf32> to vector<1x2xf32>
    %84 = arith.subf %80, %83 : vector<1x2xf32>
    %85 = math.exp %84 : vector<1x2xf32>
    %cst_75 = arith.constant dense<0.000000e+00> : vector<1xf32>
    %86 = vector.multi_reduction <add>, %85, %cst_75 [1] : vector<1x2xf32> to vector<1xf32>
    %87 = vector.shape_cast %86 : vector<1xf32> to vector<1x1xf32>
    %88 = vector.broadcast %87 : vector<1x1xf32> to vector<1x2xf32>
    %89 = arith.divf %85, %88 : vector<1x2xf32>
    %c0_76 = arith.constant 0 : index
    %c0_77 = arith.constant 0 : index
    %c0_78 = arith.constant 0 : index
    %90 = vector.load %arg27[%c0_76, %c0_77, %c0_78] : memref<1x1x2xf32, #tpu.memory_space<vmem>>, vector<1x1x2xf32>
    %91 = vector.shape_cast %90 : vector<1x1x2xf32> to vector<1x2xf32>
    %92 = vector.shape_cast %89 : vector<1x2xf32> to vector<1x1x2xf32>
    tpu.vector_store %arg27[%c0_76, %c0_77, %c0_78], %92 {strides = array<i32>} : memref<1x1x2xf32, #tpu.memory_space<vmem>>, vector<1x1x2xf32>,
    return
  }
  func.func @transform_0(%arg0: i32) -> (i32, i32, i32) {
    %c0_i32 = arith.constant 0 : i32
    %c0_i32_0 = arith.constant 0 : i32
    %c0_i32_1 = arith.constant 0 : i32
    return %arg0, %c0_i32, %c0_i32_0 : i32, i32, i32
  }
  func.func @transform_1(%arg0: i32) -> (i32, i32) {
    %c0_i32 = arith.constant 0 : i32
    %c0_i32_0 = arith.constant 0 : i32
    %c0_i32_1 = arith.constant 0 : i32
    return %c0_i32, %c0_i32_0 : i32, i32
  }
  func.func @transform_2(%arg0: i32) -> (i32, i32) {
    %c0_i32 = arith.constant 0 : i32
    %c0_i32_0 = arith.constant 0 : i32
    %c0_i32_1 = arith.constant 0 : i32
    return %c0_i32, %c0_i32_0 : i32, i32
  }
  func.func @transform_3(%arg0: i32) -> (i32, i32) {
    %c0_i32 = arith.constant 0 : i32
    %c0_i32_0 = arith.constant 0 : i32
    %c0_i32_1 = arith.constant 0 : i32
    return %c0_i32, %c0_i32_0 : i32, i32
  }
  func.func @transform_4(%arg0: i32) -> (i32, i32) {
    %c0_i32 = arith.constant 0 : i32
    %c0_i32_0 = arith.constant 0 : i32
    %c0_i32_1 = arith.constant 0 : i32
    return %c0_i32, %c0_i32_0 : i32, i32
  }
  func.func @transform_5(%arg0: i32) -> (i32, i32) {
    %c0_i32 = arith.constant 0 : i32
    %c0_i32_0 = arith.constant 0 : i32
    %c0_i32_1 = arith.constant 0 : i32
    return %c0_i32, %c0_i32_0 : i32, i32
  }
  func.func @transform_6(%arg0: i32) -> (i32, i32) {
    %c0_i32 = arith.constant 0 : i32
    %c0_i32_0 = arith.constant 0 : i32
    %c0_i32_1 = arith.constant 0 : i32
    return %c0_i32, %c0_i32_0 : i32, i32
  }
  func.func @transform_7(%arg0: i32) -> (i32, i32) {
    %c0_i32 = arith.constant 0 : i32
    %c0_i32_0 = arith.constant 0 : i32
    %c0_i32_1 = arith.constant 0 : i32
    return %c0_i32, %c0_i32_0 : i32, i32
  }
  func.func @transform_8(%arg0: i32) -> (i32, i32) {
    %c0_i32 = arith.constant 0 : i32
    %c0_i32_0 = arith.constant 0 : i32
    %c0_i32_1 = arith.constant 0 : i32
    return %c0_i32, %c0_i32_0 : i32, i32
  }
  func.func @transform_9(%arg0: i32) -> (i32, i32) {
    %c0_i32 = arith.constant 0 : i32
    %c0_i32_0 = arith.constant 0 : i32
    %c0_i32_1 = arith.constant 0 : i32
    return %c0_i32, %c0_i32_0 : i32, i32
  }
  func.func @transform_10(%arg0: i32) -> (i32, i32) {
    %c0_i32 = arith.constant 0 : i32
    %c0_i32_0 = arith.constant 0 : i32
    %c0_i32_1 = arith.constant 0 : i32
    return %c0_i32, %c0_i32_0 : i32, i32
  }
  func.func @transform_11(%arg0: i32) -> (i32, i32) {
    %c0_i32 = arith.constant 0 : i32
    %c0_i32_0 = arith.constant 0 : i32
    %c0_i32_1 = arith.constant 0 : i32
    return %c0_i32, %c0_i32_0 : i32, i32
  }
  func.func @transform_12(%arg0: i32) -> (i32, i32) {
    %c0_i32 = arith.constant 0 : i32
    %c0_i32_0 = arith.constant 0 : i32
    %c0_i32_1 = arith.constant 0 : i32
    return %c0_i32, %c0_i32_0 : i32, i32
  }
  func.func @transform_13(%arg0: i32) -> (i32, i32) {
    %c0_i32 = arith.constant 0 : i32
    %c0_i32_0 = arith.constant 0 : i32
    %c0_i32_1 = arith.constant 0 : i32
    return %c0_i32, %c0_i32_0 : i32, i32
  }
  func.func @transform_14(%arg0: i32) -> (i32, i32) {
    %c0_i32 = arith.constant 0 : i32
    %c0_i32_0 = arith.constant 0 : i32
    %c0_i32_1 = arith.constant 0 : i32
    return %c0_i32, %c0_i32_0 : i32, i32
  }
  func.func @transform_15(%arg0: i32) -> (i32, i32) {
    %c0_i32 = arith.constant 0 : i32
    %c0_i32_0 = arith.constant 0 : i32
    %c0_i32_1 = arith.constant 0 : i32
    return %c0_i32, %c0_i32_0 : i32, i32
  }
  func.func @transform_16(%arg0: i32) -> (i32, i32) {
    %c0_i32 = arith.constant 0 : i32
    %c0_i32_0 = arith.constant 0 : i32
    %c0_i32_1 = arith.constant 0 : i32
    return %c0_i32, %c0_i32_0 : i32, i32
  }
  func.func @transform_17(%arg0: i32) -> (i32, i32) {
    %c0_i32 = arith.constant 0 : i32
    %c0_i32_0 = arith.constant 0 : i32
    %c0_i32_1 = arith.constant 0 : i32
    return %c0_i32, %c0_i32_0 : i32, i32
  }
  func.func @transform_18(%arg0: i32) -> (i32, i32) {
    %c0_i32 = arith.constant 0 : i32
    %c0_i32_0 = arith.constant 0 : i32
    %c0_i32_1 = arith.constant 0 : i32
    return %c0_i32, %c0_i32_0 : i32, i32
  }
  func.func @transform_19(%arg0: i32) -> (i32, i32) {
    %c0_i32 = arith.constant 0 : i32
    %c0_i32_0 = arith.constant 0 : i32
    %c0_i32_1 = arith.constant 0 : i32
    return %c0_i32, %c0_i32_0 : i32, i32
  }
  func.func @transform_20(%arg0: i32) -> (i32, i32) {
    %c0_i32 = arith.constant 0 : i32
    %c0_i32_0 = arith.constant 0 : i32
    %c0_i32_1 = arith.constant 0 : i32
    return %c0_i32, %c0_i32_0 : i32, i32
  }
  func.func @transform_21(%arg0: i32) -> (i32, i32) {
    %c0_i32 = arith.constant 0 : i32
    %c0_i32_0 = arith.constant 0 : i32
    %c0_i32_1 = arith.constant 0 : i32
    return %c0_i32, %c0_i32_0 : i32, i32
  }
  func.func @transform_22(%arg0: i32) -> (i32, i32) {
    %c0_i32 = arith.constant 0 : i32
    %c0_i32_0 = arith.constant 0 : i32
    %c0_i32_1 = arith.constant 0 : i32
    return %c0_i32, %c0_i32_0 : i32, i32
  }
  func.func @transform_23(%arg0: i32) -> (i32, i32) {
    %c0_i32 = arith.constant 0 : i32
    %c0_i32_0 = arith.constant 0 : i32
    %c0_i32_1 = arith.constant 0 : i32
    return %c0_i32, %c0_i32_0 : i32, i32
  }
  func.func @transform_24(%arg0: i32) -> (i32, i32) {
    %c0_i32 = arith.constant 0 : i32
    %c0_i32_0 = arith.constant 0 : i32
    %c0_i32_1 = arith.constant 0 : i32
    return %c0_i32, %c0_i32_0 : i32, i32
  }
  func.func @transform_25(%arg0: i32) -> (i32, i32) {
    %c0_i32 = arith.constant 0 : i32
    %c0_i32_0 = arith.constant 0 : i32
    %c0_i32_1 = arith.constant 0 : i32
    return %c0_i32, %c0_i32_0 : i32, i32
  }
  func.func @transform_26(%arg0: i32) -> (i32, i32, i32) {
    %c0_i32 = arith.constant 0 : i32
    %c0_i32_0 = arith.constant 0 : i32
    %c0_i32_1 = arith.constant 0 : i32
    return %arg0, %c0_i32, %c0_i32_0 : i32, i32, i32
  }
}

</mosaic_0001>

<bundles_post_ra>
// kernel: basenet_forward.1
= control target key start
LH: loop header
LB: loop body
LE: loop exit
PB: predicated region body
PF: predicated region fallthrough
CT: control target
= control target key end

     0   :  { %s4064_s0 = inlined_call_operand.vmem [shape: f32[2,16,32], index: 0, kind: input, shape index: {}]   ;;  %s4065_s1 = inlined_call_operand.vmem [shape: f32[32,60], index: 1, kind: input, shape index: {}]   ;;  %s4066_s2 = inlined_call_operand.vmem [shape: f32[32,60], index: 2, kind: input, shape index: {}]   ;;  %s4067_s3 = inlined_call_operand.vmem [shape: f32[1,60], index: 3, kind: input, shape index: {}]   ;;  %s4068_s4 = inlined_call_operand.vmem [shape: f32[60,224], index: 4, kind: input, shape index: {}]   ;;  %s4069_s5 = inlined_call_operand.hbm [shape: f32[60,224], index: 5, kind: input, shape index: {}]   ;;  %s4070_s6 = inlined_call_operand.vmem [shape: f32[1,224], index: 6, kind: input, shape index: {}]   ;;  %s4071_s7 = inlined_call_operand.vmem [shape: f32[7,14], index: 7, kind: input, shape index: {}]   ;;  %s4072_s8 = inlined_call_operand.vmem [shape: f32[7,14], index: 8, kind: input, shape index: {}]   ;;  %s4073_s9 = inlined_call_operand.hbm [shape: f32[224,112], index: 9, kind: input, shape index: {}]   ;;  %s4074_s10 = inlined_call_operand.hbm [shape: f32[224,112], index: 10, kind: input, shape index: {}]   ;;  %s4075_s11 = inlined_call_operand.vmem [shape: f32[112,320], index: 11, kind: input, shape index: {}]   ;;  %s4076_s12 = inlined_call_operand.vmem [shape: f32[112,320], index: 12, kind: input, shape index: {}]   ;;  %s4077_s13 = inlined_call_operand.vmem [shape: f32[112,320], index: 13, kind: input, shape index: {}]   ;;  %s4078_s14 = inlined_call_operand.vmem [shape: f32[1,320], index: 14, kind: input, shape index: {}]   ;;  %s4079_s15 = inlined_call_operand.vmem [shape: f32[2,5], index: 15, kind: input, shape index: {}]   ;;  %s4080_s16 = inlined_call_operand.vmem [shape: f32[2,5], index: 16, kind: input, shape index: {}]   ;;  %s4081_s17 = inlined_call_operand.vmem [shape: f32[320,128], index: 17, kind: input, shape index: {}]   ;;  %s4082_s18 = inlined_call_operand.vmem [shape: f32[320,128], index: 18, kind: input, shape index: {}]   ;;  %s4083_s19 = inlined_call_operand.vmem [shape: f32[128,256], index: 19, kind: input, shape index: {}]   ;;  %s4084_s20 = inlined_call_operand.vmem [shape: f32[128,256], index: 20, kind: input, shape index: {}]   ;;  %s4085_s21 = inlined_call_operand.vmem [shape: f32[1,256], index: 21, kind: input, shape index: {}]   ;;  %s4086_s22 = inlined_call_operand.hbm [shape: f32[256,128], index: 22, kind: input, shape index: {}]   ;;  %s4087_s23 = inlined_call_operand.vmem [shape: f32[1,128], index: 23, kind: input, shape index: {}]   ;;  %s4088_s24 = inlined_call_operand.vmem [shape: f32[128,2], index: 24, kind: input, shape index: {}]   ;;  %s4089_s25 = inlined_call_operand.vmem [shape: f32[1,2], index: 25, kind: input, shape index: {}]   ;;  %s4090_s26 = inlined_call_operand.hbm [shape: f32[2,1,2], index: 26, kind: output, shape index: {}]  }
   0x1   :  { %4105 = sst [smem:[#allocation23_spill]] %s4064_s0 }
   0x2   :  { %4106 = sst [smem:[#allocation24_spill]] %s4065_s1 }
   0x3   :  { %4107 = sst [smem:[#allocation25_spill]] %s4066_s2 }
   0x4   :  { %4108 = sst [smem:[#allocation26_spill]] %s4067_s3 }
   0x5   :  { %4109 = sst [smem:[#allocation27_spill]] %s4068_s4 }
   0x6   :  { %4110 = sst [smem:[#allocation28_spill]] %s4069_s5 }
   0x7   :  { %4111 = sst [smem:[#allocation29_spill]] %s4070_s6 }
   0x8   :  { %4112 = sst [smem:[#allocation30_spill]] %s4071_s7 }
   0x9   :  { %4113 = sst [smem:[#allocation31_spill]] %s4072_s8 }
   0xa   :  { %4114 = sst [smem:[#allocation32_spill]] %s4073_s9 }
   0xb   :  { %4115 = sst [smem:[#allocation33_spill]] %s4074_s10 }
   0xc   :  { %4116 = sst [smem:[#allocation34_spill]] %s4085_s21 }
   0xd   :  { %4117 = sst [smem:[#allocation35_spill]] %s4087_s23 }
   0xe   :  { %4118 = sst [smem:[#allocation36_spill]] %s4088_s24 }
   0xf   :  { %4119 = sst [smem:[#allocation37_spill]] %s4089_s25 }
  0x10   :  { %4120 = sst [smem:[#allocation38_spill]] %s4090_s26 }
  0x11   :  { %31 = vsyncpa [#allocation3], 0 }
  0x12   :  { %32 = vsyncpa [#allocation6], 0 }
  0x13   :  { %33 = vsyncpa [#allocation9], 0 }
  0x14   :  { %34 = vsyncpa [#allocation4], 0 }
  0x15   :  { %36 = vsyncpa [#allocation4 + $0x1], 0  ;;  %s2909_s27 = smov 0   ;;  %s2911_s3 = smov 0  }
  0x16   :  { %s2913_s7 = smov 0   ;;  %s2915_s28 = smov 0  }
  0x17 LB: > { %4121 = sst [smem:[#allocation15_spill]] %s2752_s27  ;;  %s2930_s8 = sadd.s32 4294967295, %s2764_s28   ;;  %s2764_s28 = sphi %s2915_s28, %s4156_s28   ;;  %s2760_s7 = sphi %s2913_s7, %s4159_s7   ;;  %s2756_s3 = sphi %s2911_s3, %s4158_s3   ;;  %s2752_s27 = sphi %s2909_s27, %s4157_s27  }
  0x18   : > { %4122 = sst [smem:[#allocation16_spill]] %s2756_s3  ;;  %s2415_s4 = sadd.s32 4294967294, %s2764_s28  }
  0x19   : > { %4123 = sst [smem:[#allocation17_spill]] %s2760_s7  ;;  %s2934_s29 = sadd.s32 1, %s2764_s28  }
  0x1a   : > { %4124 = sst [smem:[#allocation18_spill]] %s2764_s28  ;;  %s600_s0 = sadd.s32 1, %s2760_s7 }
  0x1b   : > { %4125 = sst [smem:[#allocation19_spill]] %s2934_s29  ;;  %s597_s9 = ssub.s32 %s2764_s28, %s2934_s29 }
  0x1c   : > { %p610_p0 = scmp.ne.s32.totalorder %s2760_s7, %s2756_s3  ;;  %p598_p1 = scmp.eq.s32.totalorder %s597_s9, 0 }
  0x1d   : > { %p611_p2 = scmp.eq.s32.totalorder %s2930_s8, 1  ;;  %p616_p3 = scmp.ne.s32.totalorder %s2756_s3, %s2752_s27 }
  0x1e   : > { %p617_p4 = scmp.eq.s32.totalorder %s2415_s4, 1  ;;  %p2416_p7 = scmp.ge.s32.totalorder %s2764_s28, 1 }
  0x1f   : > { %s2945_s30 = scalar_select %p598_p1, %s2760_s7, %s600_s0  }
  0x20   : > { %p2947_p5 = por %p611_p2, %p610_p0  ;;  %p2951_p6 = por %p617_p4, %p616_p3 }
  0x21   : > { %4126 = sst [smem:[#allocation20_spill]] %s2945_s30  ;;  %p624_p8 = scmp.lt.s32.totalorder %s2764_s28, 3 }
  0x22   : > { %s4127_s2 = scalar_select %p2947_p5, 1, 0 }
  0x23   : > { %s4129_s5 = scalar_select %p2951_p6, 1, 0 }
  0x24   : > { %4128 = sst [smem:[#allocation21_spill]] %s4127_s2  ;;  %p2516_p9 = scmp.eq.s32.totalorder %s2930_s8, 0 }
  0x25   : > { %4130 = sst [smem:[#allocation22_spill]] %s4129_s5  ;;  %p2958_p10 = pnand %p2416_p7, %p624_p8 }
  0x26   : > { %s4132_s4 = sld [smem:[#allocation32_spill]]  ;;  %s2766_s9 = smov [#allocation5]  }
  0x27   : > { %p2499_p11 = pneg %p2958_p10  ;;  %s672_s30 = sshll.u32 %s2766_s9, 4  ;;  %s673_s30 = int_to_ptr.vmem [resolvable:$true] %s672_s30 }
  0x28   : > { %s4134_s27 = sld [smem:[#allocation28_spill]]  ;;  %s2767_s6 = smov 128  }
  0x29   : > { %p2969_p12 = pnand %p2516_p9, %p2499_p11  ;;  %s2768_s1 = smov 8  }
  0x2a   : > { %s2770_s2 = smov 256   ;;  %s2771_s26 = smov 16  }
  0x2b   : > { %s4135_s29 = sld [smem:[#allocation33_spill]] }
  0x2c   : > { %s670_s0 = sshll.u32 %s4132_s4, 4  ;;  %s2769_s4 = smov [#allocation2]   ;;  %s671_s0 = int_to_ptr.hbm [resolvable:$true] %s670_s0 }
  0x2d   : > { %2505 = dma.hbm_to_vmem [thread:$0]  (!%p2969_p12), %s671_s0, 3584, %s673_s30, [#allocation6], %s2767_s6, %s2767_s6, %s2768_s1  }
  0x2e   : > { %s647_s28 = sshll.u32 %s4134_s27, 4  ;;  %s649_s9 = sshll.u32 %s2769_s4, 4  ;;  %s648_s28 = int_to_ptr.hbm [resolvable:$true] %s647_s28  ;;  %s650_s9 = int_to_ptr.vmem [resolvable:$true] %s649_s9 }
  0x2f   : > { %2502 = dma.hbm_to_vmem [thread:$0]  (!%p2969_p12), %s648_s28, 2048, %s650_s9, [#allocation3], %s2770_s2, %s2770_s2, %s2771_s26  }
  0x30   : > { %s2772_s27 = smov [#allocation7]   ;;  %s731_s30 = sshll.u32 %s4086_s22, 4  ;;  %s732_s30 = int_to_ptr.hbm [resolvable:$true] %s731_s30 }
  0x31   : > { %s684_s5 = sshll.u32 %s4135_s29, 4  ;;  %s686_s23 = sshll.u32 %s2772_s27, 4  ;;  %s685_s5 = int_to_ptr.hbm [resolvable:$true] %s684_s5  ;;  %s687_s23 = int_to_ptr.vmem [resolvable:$true] %s686_s23 }
  0x32   : > { %2508 = dma.hbm_to_vmem [thread:$0]  (!%p2969_p12), %s685_s5, 3584, %s687_s23, [#allocation6], %s2767_s6, %s2767_s6, %s2768_s1  }
  0x33   : > { %s2773_s0 = smov [#allocation8]   ;;  %766 = sbr.rel (%p2958_p10) target bundleno = 1774 (0x6ee), region = 124 }
  0x34   : > { %s733_s4 = sshll.u32 %s2773_s0, 4  ;;  %s734_s4 = int_to_ptr.vmem [resolvable:$true] %s733_s4 }
  0x35   : > { %2511 = dma.hbm_to_vmem [thread:$0]  (!%p2969_p12), %s732_s30, 4096, %s734_s4, [#allocation9], %s2767_s6, %s2767_s6, %s2768_s1  }
  0x38   : > { %2735 = dma.done.wait (%p2516_p9), [#allocation3], 2048  }
  0x39   : > { %2737 = vsyncadd (%p2516_p9), [#allocation3], 4294965248 }
  0x3a   : > { %2739 = dma.done.wait (%p2516_p9), [#allocation6], 7168  }
  0x3b   : > { %2741 = vsyncadd (%p2516_p9), [#allocation6], 4294960128 }
  0x3c   : > { %2743 = dma.done.wait (%p2516_p9), [#allocation9], 4096  }
  0x3d   : > { %2745 = vsyncadd (%p2516_p9), [#allocation9], 4294963200  ;;  %p851_p13 = scmp.lt.s32.totalorder %s2930_s8, 1  ;;  %s4136_s26 = sld [smem:[#allocation23_spill]]  ;;  %vm975_vm0 = vcmask 1043456   ;;  %vm868_vm1 = vcmask 1046528  }
  0x3e   : > { %s4137_s2 = sld [smem:[#allocation25_spill]]  ;;  %vm872_vm2 = vcmask 261120   ;;  %v963_v25 = vld [vmem:[#allocation2 + $0x70] sm:$0xf]  ;;  %v964_v26 = vld [vmem:[#allocation2 + $0x78] sm:$0xf] }
  0x3f   : > { %s852_s21 = scalar_select %p851_p13, %s2930_s8, 1  ;;  %2433 = vmatpush.msk.msra.mxu2 %vm975_vm0, %v963_v25  ;;  %v961_v29 = vld [vmem:[#allocation2 + $0x60] sm:$0xff]  ;;  %v962_v30 = vld [vmem:[#allocation2 + $0x68] sm:$0xff]  ;;  %v959_v33 = vld [vmem:[#allocation2 + $0x50] sm:$0xff]  ;;  %vm970_vm3 = vcmask 490496   ;;  %vm1099_vm4 = vcmask 1045504  }
  0x40   : > { %s4138_s29 = sld [smem:[#allocation24_spill]]  ;;  %v960_v34 = vld [vmem:[#allocation2 + $0x58] sm:$0xff]  ;;  %v957_v35 = vld [vmem:[#allocation2 + $0x40] sm:$0xff]  ;;  %v958_v36 = vld [vmem:[#allocation2 + $0x48] sm:$0xff]  ;;  %vm1095_vm5 = vcmask 113664   ;;  %vm1220_vm6 = vcmask 785408  }
  0x41   : > { %s2480_s23 = sshll.u32 %s852_s21, 4  ;;  %s4139_s25 = sld [smem:[#allocation27_spill]]  ;;  %991 = vmatpush.msra.mxu2 %v961_v29  ;;  %v955_v37 = vld [vmem:[#allocation2 + $0x30] sm:$0xff]  ;;  %v956_v38 = vld [vmem:[#allocation2 + $0x38] sm:$0xff]  ;;  %v953_v39 = vld [vmem:[#allocation2 + $0x20] sm:$0xff]  ;;  %vm1420_vm7 = vcmask 916480  }
  0x42   : > { %v954_v40 = vld [vmem:[#allocation2 + $0x28] sm:$0xff]  ;;  %v951_v41 = vld [vmem:[#allocation2 + $0x10] sm:$0xff]  ;;  %v952_v42 = vld [vmem:[#allocation2 + $0x18] sm:$0xff]  ;;  %s4140_s10 = sld [smem:[#allocation26_spill]]  ;;  %vm1669_vm8 = vcmask 1044480   ;;  %vm1665_vm9 = vcmask 39936  }
  0x43   : > { %s855_s3 = scalar_lea.vmem %s4136_s26, %s2480_s23  ;;  %992 = vmatpush.msra.mxu2 %v959_v33  ;;  %v949_v43 = vld [vmem:[#allocation2] sm:$0xff]  ;;  %v950_v44 = vld [vmem:[#allocation2 + $0x8] sm:$0xff]  ;;  %v1291_v57 = vld [vmem:[#allocation7 + $0xd8] sm:$0xff]  ;;  %s4141_s9 = sld [smem:[#allocation29_spill]]  ;;  %vm1846_vm10 = vcmask 523264   ;;  %vm2280_vm11 = vcmask 8192  }
  0x44   : > { %v865_v0 = vld [vmem:[%s4137_s2 + $0x18] sm:$0xff]  ;;  %v864_v1 = vld [vmem:[%s4137_s2 + $0x10] sm:$0xff]  ;;  %v856_v3 = vld [vmem:[%s855_s3] sm:$0xff]  ;;  %s4142_s30 = sld [smem:[#allocation30_spill]] }
  0x45   : > { %889 = vmatpush.msra.mxu3 %v865_v0  ;;  %v863_v4 = vld [vmem:[%s4137_s2 + $0x8] sm:$0xff]  ;;  %v869_v6 = vrot.slane %v856_v3, 1  ;;  %v862_v11 = vld [vmem:[%s4137_s2] sm:$0xff]  ;;  %993 = vmatpush.msra.mxu2 %v957_v35  ;;  %v1290_v60 = vld [vmem:[#allocation7 + $0xd0] sm:$0xff]  ;;  %s4143_s21 = sld [smem:[#allocation31_spill]] }
  0x46   : > { %v861_v2 = vld [vmem:[%s4138_s29 + $0x18] sm:$0xff]  ;;  %v857_v5 = vld [vmem:[%s855_s3 + $0x8] sm:$0xff]  ;;  %v860_v7 = vld [vmem:[%s4138_s29 + $0x10] sm:$0xff]  ;;  %s4144_s3 = sld [smem:[#allocation36_spill]] }
  0x47   : > { %916 = vmatpush.msra.mxu1 %v861_v2  ;;  %890 = vmatpush.msra.mxu3 %v864_v1  ;;  %v870_v8 = vrot.slane %v857_v5, 1  ;;  %v859_v9 = vld [vmem:[%s4138_s29 + $0x8] sm:$0xff]  ;;  %v947_v10 = vld [vmem:[%s4139_s25 + $0x70] sm:$0xf]  ;;  %v945_v12 = vld [vmem:[%s4139_s25 + $0x60] sm:$0xff]  ;;  %s4146_s6 = sld [smem:[#allocation34_spill]] }
  0x48   : > { %2439 = vmatpush.msk.msra.mxu0 %vm975_vm0, %v947_v10  ;;  %v858_v14 = vld [vmem:[%s4138_s29] sm:$0xff]  ;;  %v943_v15 = vld [vmem:[%s4139_s25 + $0x50] sm:$0xff]  ;;  %v948_v16 = vld [vmem:[%s4139_s25 + $0x78] sm:$0xf]  ;;  %994 = vmatpush.msra.mxu2 %v955_v37  ;;  %s4147_s27 = sld [smem:[#allocation35_spill]] }
  0x49   : > { %917 = vmatpush.msra.mxu1 %v860_v7  ;;  %891 = vmatpush.msra.mxu3 %v863_v4  ;;  %v871_v13 = vsel %vm868_vm1, %v869_v6, %v870_v8  ;;  %v941_v17 = vld [vmem:[%s4139_s25 + $0x40] sm:$0xff]  ;;  %v946_v18 = vld [vmem:[%s4139_s25 + $0x68] sm:$0xff]  ;;  %v939_v19 = vld [vmem:[%s4139_s25 + $0x30] sm:$0xff]  ;;  %s4148_s4 = sld [smem:[#allocation37_spill]] }
  0x4a   : > { %1047 = vmatpush.msra.mxu0 %v945_v12  ;;  %v944_v20 = vld [vmem:[%s4139_s25 + $0x58] sm:$0xff]  ;;  %v942_v21 = vld [vmem:[%s4139_s25 + $0x48] sm:$0xff]  ;;  %v937_v23 = vld [vmem:[%s4139_s25 + $0x20] sm:$0xff]  ;;  %995 = vmatpush.msra.mxu2 %v953_v39  ;;  %s4150_s7 = sld [smem:[#allocation38_spill]] }
  0x4b   : > { %918 = vmatpush.msra.mxu1 %v859_v9  ;;  %892 = vmatpush.msra.mxu3 %v862_v11  ;;  %v940_v22 = vld [vmem:[%s4139_s25 + $0x38] sm:$0xff]  ;;  %v938_v24 = vld [vmem:[%s4139_s25 + $0x28] sm:$0xff]  ;;  %v935_v27 = vld [vmem:[%s4139_s25 + $0x10] sm:$0xff] }
  0x4c   : > { %2429 = vmatmul.msk.f32.vlgmr.msra.gmra.mxu3 %vm872_vm2, %v871_v13  ;;  %1048 = vmatpush.msra.mxu0 %v943_v15  ;;  %v936_v28 = vld [vmem:[%s4139_s25 + $0x18] sm:$0xff]  ;;  %v933_v31 = vld [vmem:[%s4139_s25] sm:$0xff]  ;;  %v934_v32 = vld [vmem:[%s4139_s25 + $0x8] sm:$0xff] }
  0x4d   : > { %919 = vmatpush.msra.mxu1 %v858_v14  ;;  %2436 = vmatpush.msk.msrb.mxu3 %vm975_vm0, %v964_v26  ;;  %v2565_v46 = vld [vmem:[%s4140_s10] ss:$0 sm:$0xff]  ;;  %v1289_v61 = vld [vmem:[#allocation7 + $0xc8] sm:$0xff]  ;;  %v1287_v1 = vld [vmem:[#allocation7 + $0xb8] sm:$0xff]  ;;  %s4145_s10 = smov %s4144_s3 }
  0x4e   : > { %2431 = vmatmul.msk.f32.vlgmr.msra.gmra.mxu1 %vm872_vm2, %v856_v3  ;;  %1049 = vmatpush.msra.mxu0 %v941_v17  ;;  %v1288_v0 = vld [vmem:[#allocation7 + $0xc0] sm:$0xff]  ;;  %v1286_v3 = vld [vmem:[#allocation7 + $0xb0] sm:$0xff]  ;;  %v1205_v25 = vld [vmem:[#allocation5 + $0x68] sm:$0xff] }
  0x4f   : > { %2442 = vmatpush.msk.msrb.mxu1 %vm975_vm0, %v948_v16  ;;  %1014 = vmatpush.msrb.mxu3 %v962_v30  ;;  %v1084_v2 = vld [vmem:[%s4141_s9] sm:$0x3]  ;;  %v1218_v26 = vld [vmem:[#allocation5 + $0xd0] sm:$0xff]  ;;  %v1217_v30 = vld [vmem:[#allocation5 + $0xc8] sm:$0xff] }
  0x50   : > { %1050 = vmatpush.msra.mxu0 %v939_v19  ;;  %996 = vmatpush.msra.mxu2 %v951_v41  ;;  %v1087_v6 = vperm.slane %v1084_v2, 1  ;;  %v1207_v19 = vld [vmem:[#allocation5 + $0x78] sm:$0xff]  ;;  %v1276_v29 = vld [vmem:[#allocation7 + $0x60] sm:$0xff]  ;;  %v1274_v35 = vld [vmem:[#allocation7 + $0x50] sm:$0xff] }
  0x51   : > { %1070 = vmatpush.msrb.mxu1 %v946_v18  ;;  %1015 = vmatpush.msrb.mxu3 %v960_v34  ;;  %v1094_v18 = vld [vmem:[%s4142_s30] sm:$0x7f]  ;;  %v1202_v34 = vld [vmem:[#allocation5 + $0x50] sm:$0xff]  ;;  %v1201_v37 = vld [vmem:[#allocation5 + $0x48] sm:$0xff] }
  0x52   : > { %1051 = vmatpush.msra.mxu0 %v937_v23  ;;  %997 = vmatpush.msra.mxu2 %v949_v43  ;;  %v1219_v23 = vld [vmem:[#allocation5 + $0xd8] sm:$0xff]  ;;  %v1216_v33 = vld [vmem:[#allocation5 + $0xc0] sm:$0xff]  ;;  %v1214_v39 = vld [vmem:[#allocation5 + $0xb0] sm:$0xff] }
  0x53   : > { %1071 = vmatpush.msrb.mxu1 %v944_v20  ;;  %1016 = vmatpush.msrb.mxu3 %v958_v36  ;;  %v1279_v20 = vld [vmem:[#allocation7 + $0x78] sm:$0xff]  ;;  %v1272_v41 = vld [vmem:[#allocation7 + $0x40] sm:$0xff] }
  0x54   : > { %2430 = vmatmul.msk.f32.gmra.mxu3 %vm872_vm2, %v870_v8  ;;  %1052 = vmatpush.msra.mxu0 %v935_v27  ;;  %v1086_v8 = vperm.slane %v1084_v2, 0  ;;  %v1277_v27 = vld [vmem:[#allocation7 + $0x68] sm:$0xff]  ;;  %v1215_v36 = vld [vmem:[#allocation5 + $0xb8] sm:$0xff]  ;;  %v1192_v2 = vld [vmem:[#allocation5] sm:$0xff] }
  0x55   : > { %1072 = vmatpush.msrb.mxu1 %v942_v21  ;;  %1017 = vmatpush.msrb.mxu3 %v956_v38  ;;  %v1146_v21 = vld [vmem:[%s4143_s21] sm:$0x7f]  ;;  %v1273_v38 = vld [vmem:[#allocation7 + $0x48] sm:$0xff]  ;;  %v1271_v43 = vld [vmem:[#allocation7 + $0x38] sm:$0xff]  ;;  %s4149_s21 = sld [smem:[#allocation16_spill]] }
  0x56   : > { %2432 = vmatmul.msk.f32.gmra.mxu1 %vm872_vm2, %v857_v5  ;;  %1053 = vmatpush.msra.mxu0 %v933_v31  ;;  %v1203_v31 = vld [vmem:[#allocation5 + $0x58] sm:$0xff] }
  0x57   : > { %1073 = vmatpush.msrb.mxu1 %v940_v22  ;;  %1018 = vmatpush.msrb.mxu3 %v954_v40  ;;  %v1206_v22 = vld [vmem:[#allocation5 + $0x70] sm:$0xff]  ;;  %v1200_v40 = vld [vmem:[#allocation5 + $0x40] sm:$0xff] }
  0x59   : > { %1074 = vmatpush.msrb.mxu1 %v938_v24  ;;  %1019 = vmatpush.msrb.mxu3 %v952_v42  ;;  %v1278_v24 = vld [vmem:[#allocation7 + $0x70] sm:$0xff]  ;;  %v1199_v42 = vld [vmem:[#allocation5 + $0x38] sm:$0xff] }
  0x5b   : > { %1075 = vmatpush.msrb.mxu1 %v936_v28  ;;  %1020 = vmatpush.msrb.mxu3 %v950_v44  ;;  %v1204_v28 = vld [vmem:[#allocation5 + $0x60] sm:$0xff]  ;;  %v1198_v44 = vld [vmem:[#allocation5 + $0x30] sm:$0xff]  ;;  %s849_s23 = sand.u32 1, %s4149_s21  }
  0x5c   : > { %s850_s1 = scalar_lea.vmem [#allocation10], %s849_s23 }
  0x5d   : > { %1076 = vmatpush.msrb.mxu1 %v934_v32  ;;  %v1275_v32 = vld [vmem:[#allocation7 + $0x58] sm:$0xff]  ;;  %s2317_s9 = sshll.u32 %s850_s1, 4  ;;  %s2318_s9 = int_to_ptr.vmem [resolvable:$true] %s2317_s9 }
  0x5f   : > { %1316 = vmatpush.msra.mxu1 %v1291_v57  ;;  %v1283_v57 = vld [vmem:[#allocation7 + $0x98] sm:$0xff] }
  0x61   : > { %1317 = vmatpush.msra.mxu1 %v1290_v60  ;;  %v1266_v60 = vld [vmem:[#allocation7 + $0x10] sm:$0xff] }
  0x63   : > { %1318 = vmatpush.msra.mxu1 %v1289_v61  ;;  %v1282_v61 = vld [vmem:[#allocation7 + $0x90] sm:$0xff] }
  0x65   : > { %1319 = vmatpush.msra.mxu1 %v1288_v0  ;;  %v1265_v0 = vld [vmem:[#allocation7 + $0x8] sm:$0xff] }
  0x67   : > { %1320 = vmatpush.msra.mxu1 %v1287_v1  ;;  %v1281_v1 = vld [vmem:[#allocation7 + $0x88] sm:$0xff] }
  0x69   : > { %1321 = vmatpush.msra.mxu1 %v1286_v3  ;;  %v1208_v3 = vld [vmem:[#allocation5 + $0x80] sm:$0xff] }
  0xcb   : > { %v921_v45 = vpop.f32.mrf.mxu1 }
  0xcf   : > { %v894_v47 = vpop.f32.mrf.mxu3 }
  0xd0   : > { %v922_v48 = vadd.f32 %v921_v45, %v894_v47  ;;  %v1270_v45 = vld [vmem:[#allocation7 + $0x30] sm:$0xff]  ;;  %v1213_v47 = vld [vmem:[#allocation5 + $0xa8] sm:$0xff] }
  0xd2   : > { %v931_v49 = vadd.f32 %v2565_v46, %v922_v48  ;;  %v1269_v48 = vld [vmem:[#allocation7 + $0x28] sm:$0xff] }
  0xd3   : > { %v924_v50 = vpop.f32.mrf.mxu1 }
  0xd4   : > { %2440 = vmatmul.msk.f32.vlgmr.msra.gmra.mxu0 %vm970_vm3, %v931_v49  ;;  %2443 = vmatmul.msk.f32.vlgmr.msrb.gmra.mxu1 %vm970_vm3, %v931_v49  ;;  %v967_v54 = vrot.slane %v931_v49, 1  ;;  %v1285_v49 = vld [vmem:[#allocation7 + $0xa8] sm:$0xff] }
  0xd5   : > { %1322 = vmatpush.msra.mxu1 %v1285_v49  ;;  %v1386_v49 = vld [vmem:[%s4076_s12 + $0x50] sm:$0xff] }
  0xd7   : > { %v897_v51 = vpop.f32.mrf.mxu3 }
  0xd8   : > { %v925_v52 = vadd.f32 %v924_v50, %v897_v51  ;;  %v1196_v50 = vld [vmem:[#allocation5 + $0x20] sm:$0xff] }
  0xd9   : > { %v1212_v51 = vld [vmem:[#allocation5 + $0xa0] sm:$0xff] }
  0xda   : > { %v932_v53 = vadd.f32 %v2565_v46, %v925_v52  ;;  %v1197_v46 = vld [vmem:[#allocation5 + $0x28] sm:$0xff]  ;;  %v1268_v52 = vld [vmem:[#allocation7 + $0x20] sm:$0xff] }
  0xdc   : > { %2441 = vmatmul.msk.f32.gmra.mxu0 %vm970_vm3, %v932_v53  ;;  %2444 = vmatmul.msk.f32.gmra.mxu1 %vm970_vm3, %v932_v53  ;;  %v968_v55 = vrot.slane %v932_v53, 1  ;;  %v1284_v53 = vld [vmem:[#allocation7 + $0xa0] sm:$0xff] }
  0xdd   : > { %1323 = vmatpush.msra.mxu1 %v1284_v53  ;;  %v1340_v53 = vld [vmem:[%s4075_s11 + $0x30] sm:$0xff] }
  0xde   : > { %v969_v56 = vsel %vm868_vm1, %v967_v54, %v968_v55  ;;  %v1195_v54 = vld [vmem:[#allocation5 + $0x18] sm:$0xff] }
  0xdf   : > { %2434 = vmatmul.msk.f32.vlgmr.msra.gmra.mxu2 %vm970_vm3, %v969_v56  ;;  %2437 = vmatmul.msk.f32.vlgmr.msrb.gmra.mxu3 %vm970_vm3, %v969_v56  ;;  %v1267_v56 = vld [vmem:[#allocation7 + $0x18] sm:$0xff] }
  0xe0   : > { %1324 = vmatpush.msra.mxu1 %v1283_v57  ;;  %v1383_v57 = vld [vmem:[%s4076_s12 + $0x38] sm:$0xff] }
  0xe2   : > { %1325 = vmatpush.msra.mxu1 %v1282_v61  ;;  %v1380_v61 = vld [vmem:[%s4076_s12 + $0x20] sm:$0xff] }
  0xe4   : > { %1326 = vmatpush.msra.mxu1 %v1281_v1  ;;  %v1377_v1 = vld [vmem:[%s4076_s12 + $0x8] sm:$0xff] }
  0xe7   : > { %2435 = vmatmul.msk.f32.gmra.mxu2 %vm970_vm3, %v968_v55  ;;  %2438 = vmatmul.msk.f32.gmra.mxu3 %vm970_vm3, %v968_v55  ;;  %v1211_v55 = vld [vmem:[#allocation5 + $0x98] sm:$0xff] }
 0x151   : > { %v1055_v58 = vpop.f32.mrf.mxu0  ;;  %v1078_v59 = vpop.f32.mrf.mxu1 }
 0x159   : > { %v1058_v4 = vpop.f32.mrf.mxu0  ;;  %v1081_v5 = vpop.f32.mrf.mxu1 }
 0x162   : > { %v999_v62 = vpop.f32.mrf.mxu2  ;;  %v1022_v63 = vpop.f32.mrf.mxu3 }
 0x163   : > { %v1056_v10 = vadd.f32 %v1055_v58, %v999_v62  ;;  %v1079_v11 = vadd.f32 %v1078_v59, %v1022_v63  ;;  %v1194_v58 = vld [vmem:[#allocation5 + $0x10] sm:$0xff]  ;;  %v1193_v62 = vld [vmem:[#allocation5 + $0x8] sm:$0xff] }
 0x164   : > { %v1210_v59 = vld [vmem:[#allocation5 + $0x90] sm:$0xff]  ;;  %v1209_v63 = vld [vmem:[#allocation5 + $0x88] sm:$0xff] }
 0x165   : > { %v1091_v16 = vadd.f32 %v1087_v6, %v1079_v11  ;;  %v1090_v17 = vadd.f32 %v1086_v8, %v1056_v10  ;;  %v1417_v10 = vld [vmem:[%s4076_s12 + $0x148] sm:$0xff]  ;;  %v1370_v11 = vld [vmem:[%s4075_s11 + $0x120] sm:$0xff] }
 0x16a   : > { %v1002_v7 = vpop.f32.mrf.mxu2  ;;  %v1025_v9 = vpop.f32.mrf.mxu3 }
 0x16b   : > { %v1059_v12 = vadd.f32 %v1058_v4, %v1002_v7  ;;  %v1082_v13 = vadd.f32 %v1081_v5, %v1025_v9  ;;  %v1264_v4 = vld [vmem:[#allocation7] sm:$0xff] }
 0x16c   : > { %v1280_v5 = vld [vmem:[#allocation7 + $0x80] sm:$0xff] }
 0x16d   : > { %v1092_v14 = vadd.f32 %v1086_v8, %v1059_v12  ;;  %v1093_v15 = vadd.f32 %v1087_v6, %v1082_v13  ;;  %v1415_v6 = vld [vmem:[%s4076_s12 + $0x138] sm:$0xff]  ;;  %1327 = vmatpush.msra.mxu1 %v1280_v5  ;;  %v1412_v7 = vld [vmem:[%s4076_s12 + $0x120] sm:$0xff]  ;;  %v1409_v12 = vld [vmem:[%s4076_s12 + $0x108] sm:$0xff] }
 0x16e   : > { %v1373_v8 = vld [vmem:[%s4075_s11 + $0x138] sm:$0xff]  ;;  %v1416_v9 = vld [vmem:[%s4076_s12 + $0x140] sm:$0xff]  ;;  %v1413_v13 = vld [vmem:[%s4076_s12 + $0x128] sm:$0xff] }
 0x16f   : > { %2445 = vmatpush.msk.msrb.mxu2 %vm1099_vm4, %v1092_v14  ;;  %2447 = vmatpush.msk.msra.mxu3 %vm1099_vm4, %v1093_v15  ;;  %v1374_v5 = vld [vmem:[%s4075_s11 + $0x140] sm:$0xff] }
 0x170   : > { %2449 = vmatpush.msk.msrb.mxu0 %vm1099_vm4, %v1092_v14  ;;  %1445 = vmatpush.msrb.mxu1 %v1416_v9  ;;  %v1414_v14 = vld [vmem:[%s4076_s12 + $0x130] sm:$0xff]  ;;  %v1371_v9 = vld [vmem:[%s4075_s11 + $0x128] sm:$0xff] }
 0x171   : > { %1121 = vmatpush.msrb.mxu2 %v1090_v17  ;;  %1141 = vmatpush.msra.mxu3 %v1091_v16 }
 0x172   : > { %1165 = vmatpush.msrb.mxu0 %v1090_v17  ;;  %2448 = vmatmul.msk.f32.vlgmr.msra.gmra.mxu3 %vm1095_vm5, %v1094_v18  ;;  %v1406_v17 = vld [vmem:[%s4076_s12 + $0xf0] sm:$0xff] }
 0x173   : > { %2451 = vmatpush.msk.msrb.mxu3 %vm1099_vm4, %v1093_v15  ;;  %2446 = vmatmul.msk.f32.vlgmr.msrb.gmra.mxu2 %vm1095_vm5, %v1094_v18  ;;  %v1367_v15 = vld [vmem:[%s4075_s11 + $0x108] sm:$0xff]  ;;  %v1411_v18 = vld [vmem:[%s4076_s12 + $0x118] sm:$0xff] }
 0x174   : > { %2450 = vmatmul.msk.f32.vlgmr.msrb.gmra.mxu0 %vm1095_vm5, %v1146_v21  ;;  %1224 = vmatpush.msra.mxu2 %v1207_v19  ;;  %v1364_v19 = vld [vmem:[%s4075_s11 + $0xf0] sm:$0xff] }
 0x175   : > { %1185 = vmatpush.msrb.mxu3 %v1091_v16  ;;  %1292 = vmatpush.msra.mxu0 %v1279_v20  ;;  %v1410_v16 = vld [vmem:[%s4076_s12 + $0x110] sm:$0xff]  ;;  %v1407_v20 = vld [vmem:[%s4076_s12 + $0xf8] sm:$0xff] }
 0x176   : > { %1225 = vmatpush.msra.mxu2 %v1206_v22  ;;  %1446 = vmatpush.msrb.mxu1 %v1413_v13  ;;  %v1403_v22 = vld [vmem:[%s4076_s12 + $0xd8] sm:$0xff]  ;;  %v1368_v13 = vld [vmem:[%s4075_s11 + $0x110] sm:$0xff] }
 0x177   : > { %1248 = vmatpush.msra.mxu3 %v1219_v23  ;;  %1293 = vmatpush.msra.mxu0 %v1278_v24  ;;  %v1361_v23 = vld [vmem:[%s4075_s11 + $0xd8] sm:$0xff]  ;;  %v1404_v24 = vld [vmem:[%s4076_s12 + $0xe0] sm:$0xff] }
 0x178   : > { %1226 = vmatpush.msra.mxu2 %v1205_v25  ;;  %1447 = vmatpush.msrb.mxu1 %v1410_v16  ;;  %v1405_v25 = vld [vmem:[%s4076_s12 + $0xe8] sm:$0xff] }
 0x179   : > { %1249 = vmatpush.msra.mxu3 %v1218_v26  ;;  %1294 = vmatpush.msra.mxu0 %v1277_v27  ;;  %v1400_v26 = vld [vmem:[%s4076_s12 + $0xc0] sm:$0xff]  ;;  %v1359_v16 = vld [vmem:[%s4075_s11 + $0xc8] sm:$0xff] }
 0x17a   : > { %2452 = vmatmul.msk.f32.vlgmr.msrb.gmra.mxu3 %vm1095_vm5, %v1146_v21  ;;  %1227 = vmatpush.msra.mxu2 %v1204_v28  ;;  %v1408_v21 = vld [vmem:[%s4076_s12 + $0x100] sm:$0xff]  ;;  %v1401_v28 = vld [vmem:[%s4076_s12 + $0xc8] sm:$0xff] }
 0x17b   : > { %1295 = vmatpush.msra.mxu0 %v1276_v29  ;;  %1250 = vmatpush.msra.mxu3 %v1217_v30  ;;  %v1358_v27 = vld [vmem:[%s4075_s11 + $0xc0] sm:$0xff]  ;;  %v1402_v29 = vld [vmem:[%s4076_s12 + $0xd0] sm:$0xff]  ;;  %v1397_v30 = vld [vmem:[%s4076_s12 + $0xa8] sm:$0xff] }
 0x17c   : > { %1228 = vmatpush.msra.mxu2 %v1203_v31  ;;  %1448 = vmatpush.msrb.mxu1 %v1407_v20  ;;  %v1355_v31 = vld [vmem:[%s4075_s11 + $0xa8] sm:$0xff]  ;;  %v1576_v20 = vld [vmem:[%s4077_s13 + $0xf8] sm:$0xff] }
 0x17d   : > { %1296 = vmatpush.msra.mxu0 %v1275_v32  ;;  %1251 = vmatpush.msra.mxu3 %v1216_v33  ;;  %v1398_v32 = vld [vmem:[%s4076_s12 + $0xb0] sm:$0xff]  ;;  %v1399_v33 = vld [vmem:[%s4076_s12 + $0xb8] sm:$0xff] }
 0x17e   : > { %1229 = vmatpush.msra.mxu2 %v1202_v34  ;;  %1449 = vmatpush.msrb.mxu1 %v1404_v24  ;;  %v1394_v34 = vld [vmem:[%s4076_s12 + $0x90] sm:$0xff]  ;;  %v1573_v24 = vld [vmem:[%s4077_s13 + $0xe0] sm:$0xff] }
 0x17f   : > { %1297 = vmatpush.msra.mxu0 %v1274_v35  ;;  %1252 = vmatpush.msra.mxu3 %v1215_v36  ;;  %v1352_v35 = vld [vmem:[%s4075_s11 + $0x90] sm:$0xff]  ;;  %v1395_v36 = vld [vmem:[%s4076_s12 + $0x98] sm:$0xff] }
 0x180   : > { %1230 = vmatpush.msra.mxu2 %v1201_v37  ;;  %1450 = vmatpush.msrb.mxu1 %v1401_v28  ;;  %v1396_v37 = vld [vmem:[%s4076_s12 + $0xa0] sm:$0xff]  ;;  %v1570_v28 = vld [vmem:[%s4077_s13 + $0xc8] sm:$0xff] }
 0x181   : > { %1298 = vmatpush.msra.mxu0 %v1273_v38  ;;  %1253 = vmatpush.msra.mxu3 %v1214_v39  ;;  %v1391_v38 = vld [vmem:[%s4076_s12 + $0x78] sm:$0xff] }
 0x182   : > { %1231 = vmatpush.msra.mxu2 %v1200_v40  ;;  %1451 = vmatpush.msrb.mxu1 %v1398_v32  ;;  %v1349_v39 = vld [vmem:[%s4075_s11 + $0x78] sm:$0xff]  ;;  %v1392_v40 = vld [vmem:[%s4076_s12 + $0x80] sm:$0xff]  ;;  %v1567_v32 = vld [vmem:[%s4077_s13 + $0xb0] sm:$0xff] }
 0x183   : > { %1299 = vmatpush.msra.mxu0 %v1272_v41  ;;  %1254 = vmatpush.msra.mxu3 %v1213_v47  ;;  %v1393_v41 = vld [vmem:[%s4076_s12 + $0x88] sm:$0xff] }
 0x184   : > { %1232 = vmatpush.msra.mxu2 %v1199_v42  ;;  %v1388_v42 = vld [vmem:[%s4076_s12 + $0x60] sm:$0xff]  ;;  %1452 = vmatpush.msrb.mxu1 %v1395_v36  ;;  %v1343_v47 = vld [vmem:[%s4075_s11 + $0x48] sm:$0xff]  ;;  %v1564_v36 = vld [vmem:[%s4077_s13 + $0x98] sm:$0xff] }
 0x185   : > { %1300 = vmatpush.msra.mxu0 %v1271_v43  ;;  %1255 = vmatpush.msra.mxu3 %v1212_v51  ;;  %v1346_v43 = vld [vmem:[%s4075_s11 + $0x60] sm:$0xff] }
 0x186   : > { %1233 = vmatpush.msra.mxu2 %v1198_v44  ;;  %v1389_v44 = vld [vmem:[%s4076_s12 + $0x68] sm:$0xff]  ;;  %1453 = vmatpush.msrb.mxu1 %v1392_v40  ;;  %v1561_v40 = vld [vmem:[%s4077_s13 + $0x80] sm:$0xff] }
 0x187   : > { %1301 = vmatpush.msra.mxu0 %v1270_v45  ;;  %1256 = vmatpush.msra.mxu3 %v1211_v55  ;;  %v1390_v45 = vld [vmem:[%s4076_s12 + $0x70] sm:$0xff] }
 0x188   : > { %1234 = vmatpush.msra.mxu2 %v1197_v46  ;;  %v1385_v46 = vld [vmem:[%s4076_s12 + $0x48] sm:$0xff]  ;;  %1454 = vmatpush.msrb.mxu1 %v1389_v44 }
 0x189   : > { %1302 = vmatpush.msra.mxu0 %v1269_v48  ;;  %1257 = vmatpush.msra.mxu3 %v1210_v59  ;;  %v1337_v59 = vld [vmem:[%s4075_s11 + $0x18] sm:$0xff]  ;;  %v1558_v44 = vld [vmem:[%s4077_s13 + $0x68] sm:$0xff] }
 0x18a   : > { %1235 = vmatpush.msra.mxu2 %v1196_v50  ;;  %v1387_v50 = vld [vmem:[%s4076_s12 + $0x58] sm:$0xff]  ;;  %1455 = vmatpush.msrb.mxu1 %v1386_v49 }
 0x18b   : > { %1303 = vmatpush.msra.mxu0 %v1268_v52  ;;  %1258 = vmatpush.msra.mxu3 %v1209_v63  ;;  %v1382_v52 = vld [vmem:[%s4076_s12 + $0x30] sm:$0xff]  ;;  %v1334_v63 = vld [vmem:[%s4075_s11] sm:$0xff]  ;;  %v1345_v49 = vld [vmem:[%s4075_s11 + $0x58] sm:$0xff] }
 0x18c   : > { %1236 = vmatpush.msra.mxu2 %v1195_v54  ;;  %1456 = vmatpush.msrb.mxu1 %v1383_v57  ;;  %v1546_v57 = vld [vmem:[%s4077_s13 + $0x8] sm:$0xff] }
 0x18d   : > { %1304 = vmatpush.msra.mxu0 %v1267_v56  ;;  %1259 = vmatpush.msra.mxu3 %v1208_v3  ;;  %v1379_v56 = vld [vmem:[%s4076_s12 + $0x18] sm:$0xff] }
 0x18e   : > { %1237 = vmatpush.msra.mxu2 %v1194_v58  ;;  %v1384_v58 = vld [vmem:[%s4076_s12 + $0x40] sm:$0xff]  ;;  %1457 = vmatpush.msrb.mxu1 %v1380_v61 }
 0x18f   : > { %1305 = vmatpush.msra.mxu0 %v1266_v60  ;;  %1425 = vmatpush.msrb.mxu3 %v1415_v6  ;;  %v1376_v60 = vld [vmem:[%s4076_s12] sm:$0xff]  ;;  %v1375_v6 = vld [vmem:[%s4075_s11 + $0x148] sm:$0xff] }
 0x190   : > { %1238 = vmatpush.msra.mxu2 %v1193_v62  ;;  %v1381_v62 = vld [vmem:[%s4076_s12 + $0x28] sm:$0xff]  ;;  %1458 = vmatpush.msrb.mxu1 %v1377_v1 }
 0x191   : > { %1306 = vmatpush.msra.mxu0 %v1265_v0  ;;  %1426 = vmatpush.msrb.mxu3 %v1412_v7  ;;  %v1585_v0 = vld [vmem:[%s4077_s13 + $0x140] sm:$0xff]  ;;  %v1584_v7 = vld [vmem:[%s4077_s13 + $0x138] sm:$0xff] }
 0x192   : > { %1239 = vmatpush.msra.mxu2 %v1192_v2  ;;  %v1378_v2 = vld [vmem:[%s4076_s12 + $0x10] sm:$0xff] }
 0x193   : > { %1307 = vmatpush.msra.mxu0 %v1264_v4  ;;  %1427 = vmatpush.msrb.mxu3 %v1409_v12  ;;  %v1579_v12 = vld [vmem:[%s4077_s13 + $0x110] sm:$0xff] }
 0x194   : > { %1465 = vmatpush.msrb.mxu2 %v1417_v10  ;;  %v1372_v10 = vld [vmem:[%s4075_s11 + $0x130] sm:$0xff] }
 0x195   : > { %1487 = vmatpush.msrb.mxu0 %v1373_v8  ;;  %1428 = vmatpush.msrb.mxu3 %v1406_v17  ;;  %v1582_v8 = vld [vmem:[%s4077_s13 + $0x128] sm:$0xff]  ;;  %v1356_v17 = vld [vmem:[%s4075_s11 + $0xb0] sm:$0xff] }
 0x196   : > { %1466 = vmatpush.msrb.mxu2 %v1414_v14  ;;  %v1365_v14 = vld [vmem:[%s4075_s11 + $0xf8] sm:$0xff] }
 0x197   : > { %1488 = vmatpush.msrb.mxu0 %v1370_v11  ;;  %1429 = vmatpush.msrb.mxu3 %v1403_v22  ;;  %v1581_v11 = vld [vmem:[%s4077_s13 + $0x120] sm:$0xff] }
 0x198   : > { %1467 = vmatpush.msrb.mxu2 %v1411_v18  ;;  %v1369_v18 = vld [vmem:[%s4075_s11 + $0x118] sm:$0xff]  ;;  %v1366_v22 = vld [vmem:[%s4075_s11 + $0x100] sm:$0xff] }
 0x199   : > { %1489 = vmatpush.msrb.mxu0 %v1367_v15  ;;  %1430 = vmatpush.msrb.mxu3 %v1400_v26  ;;  %v1362_v15 = vld [vmem:[%s4075_s11 + $0xe0] sm:$0xff]  ;;  %v1363_v26 = vld [vmem:[%s4075_s11 + $0xe8] sm:$0xff] }
 0x19a   : > { %1468 = vmatpush.msrb.mxu2 %v1408_v21  ;;  %v1353_v21 = vld [vmem:[%s4075_s11 + $0x98] sm:$0xff] }
 0x19b   : > { %1490 = vmatpush.msrb.mxu0 %v1364_v19  ;;  %1431 = vmatpush.msrb.mxu3 %v1397_v30  ;;  %v1578_v19 = vld [vmem:[%s4077_s13 + $0x108] sm:$0xff]  ;;  %v1360_v30 = vld [vmem:[%s4075_s11 + $0xd0] sm:$0xff] }
 0x19c   : > { %1469 = vmatpush.msrb.mxu2 %v1405_v25  ;;  %v1350_v25 = vld [vmem:[%s4075_s11 + $0x80] sm:$0xff] }
 0x19d   : > { %1491 = vmatpush.msrb.mxu0 %v1361_v23  ;;  %1432 = vmatpush.msrb.mxu3 %v1394_v34  ;;  %v1575_v23 = vld [vmem:[%s4077_s13 + $0xf0] sm:$0xff]  ;;  %v1357_v34 = vld [vmem:[%s4075_s11 + $0xb8] sm:$0xff] }
 0x19e   : > { %1470 = vmatpush.msrb.mxu2 %v1402_v29  ;;  %v1347_v29 = vld [vmem:[%s4075_s11 + $0x68] sm:$0xff] }
 0x19f   : > { %1492 = vmatpush.msrb.mxu0 %v1358_v27  ;;  %1433 = vmatpush.msrb.mxu3 %v1391_v38  ;;  %v1572_v27 = vld [vmem:[%s4077_s13 + $0xd8] sm:$0xff]  ;;  %v1354_v38 = vld [vmem:[%s4075_s11 + $0xa0] sm:$0xff] }
 0x1a0   : > { %1471 = vmatpush.msrb.mxu2 %v1399_v33  ;;  %v1344_v33 = vld [vmem:[%s4075_s11 + $0x50] sm:$0xff] }
 0x1a1   : > { %1493 = vmatpush.msrb.mxu0 %v1355_v31  ;;  %1434 = vmatpush.msrb.mxu3 %v1388_v42  ;;  %v1569_v31 = vld [vmem:[%s4077_s13 + $0xc0] sm:$0xff]  ;;  %v1351_v42 = vld [vmem:[%s4075_s11 + $0x88] sm:$0xff] }
 0x1a2   : > { %1472 = vmatpush.msrb.mxu2 %v1396_v37  ;;  %v1341_v37 = vld [vmem:[%s4075_s11 + $0x38] sm:$0xff] }
 0x1a3   : > { %1494 = vmatpush.msrb.mxu0 %v1352_v35  ;;  %1435 = vmatpush.msrb.mxu3 %v1385_v46  ;;  %v1566_v35 = vld [vmem:[%s4077_s13 + $0xa8] sm:$0xff]  ;;  %v1348_v46 = vld [vmem:[%s4075_s11 + $0x70] sm:$0xff] }
 0x1a4   : > { %1473 = vmatpush.msrb.mxu2 %v1393_v41  ;;  %v1338_v41 = vld [vmem:[%s4075_s11 + $0x20] sm:$0xff] }
 0x1a5   : > { %1495 = vmatpush.msrb.mxu0 %v1349_v39  ;;  %1436 = vmatpush.msrb.mxu3 %v1382_v52  ;;  %v1563_v39 = vld [vmem:[%s4077_s13 + $0x90] sm:$0xff]  ;;  %v1342_v52 = vld [vmem:[%s4075_s11 + $0x40] sm:$0xff] }
 0x1a6   : > { %1474 = vmatpush.msrb.mxu2 %v1390_v45  ;;  %v1335_v45 = vld [vmem:[%s4075_s11 + $0x8] sm:$0xff] }
 0x1a7   : > { %1496 = vmatpush.msrb.mxu0 %v1346_v43  ;;  %1437 = vmatpush.msrb.mxu3 %v1379_v56  ;;  %v1560_v43 = vld [vmem:[%s4077_s13 + $0x78] sm:$0xff] }
 0x1a8   : > { %1475 = vmatpush.msrb.mxu2 %v1387_v50  ;;  %v1554_v50 = vld [vmem:[%s4077_s13 + $0x48] sm:$0xff]  ;;  %v1548_v56 = vld [vmem:[%s4077_s13 + $0x18] sm:$0xff] }
 0x1a9   : > { %1497 = vmatpush.msrb.mxu0 %v1343_v47  ;;  %1438 = vmatpush.msrb.mxu3 %v1376_v60  ;;  %v1557_v47 = vld [vmem:[%s4077_s13 + $0x60] sm:$0xff] }
 0x1aa   : > { %1476 = vmatpush.msrb.mxu2 %v1384_v58  ;;  %v1336_v58 = vld [vmem:[%s4075_s11 + $0x10] sm:$0xff] }
 0x1ab   : > { %1498 = vmatpush.msrb.mxu0 %v1340_v53  ;;  %v1551_v53 = vld [vmem:[%s4077_s13 + $0x30] sm:$0xff] }
 0x1ac   : > { %1477 = vmatpush.msrb.mxu2 %v1381_v62 }
 0x1ad   : > { %1499 = vmatpush.msrb.mxu0 %v1337_v59  ;;  %v1545_v59 = vld [vmem:[%s4077_s13] sm:$0xff] }
 0x1ae   : > { %1478 = vmatpush.msrb.mxu2 %v1378_v2 }
 0x1af   : > { %1500 = vmatpush.msrb.mxu0 %v1334_v63 }
 0x1f1   : > { %v1167_v48 = vpop.f32.mrf.mxu0 }
 0x1f5   : > { %v1143_v51 = vpop.f32.mrf.mxu3 }
 0x1f6   : > { %v1123_v54 = vpop.f32.mrf.mxu2 }
 0x1f7   : > { %v1190_v55 = vmax.f32 %v1123_v54, %v1167_v48  ;;  %v1555_v48 = vld [vmem:[%s4077_s13 + $0x50] sm:$0xff]  ;;  %v1549_v54 = vld [vmem:[%s4077_s13 + $0x20] sm:$0xff] }
 0x1f9   : > { %1240 = vmatmul.f32.vlgmr.msra.gmra.mxu2 %v1190_v55  ;;  %1308 = vmatmul.f32.vlgmr.msra.gmra.mxu0 %v1190_v55  ;;  %v1339_v55 = vld [vmem:[%s4075_s11 + $0x28] sm:$0xff] }
 0x1fa   : > { %1612 = vmatpush.msra.mxu0 %v1585_v0  ;;  %1592 = vmatpush.msra.mxu2 %v1584_v7  ;;  %v1580_v7 = vld [vmem:[%s4077_s13 + $0x118] sm:$0xff] }
 0x1fc   : > { %1613 = vmatpush.msra.mxu0 %v1582_v8  ;;  %1593 = vmatpush.msra.mxu2 %v1581_v11  ;;  %v1571_v11 = vld [vmem:[%s4077_s13 + $0xd0] sm:$0xff] }
 0x1fd   : > { %v1187_v3 = vpop.f32.mrf.mxu3 }
 0x1fe   : > { %v1191_v4 = vmax.f32 %v1143_v51, %v1187_v3  ;;  %1614 = vmatpush.msra.mxu0 %v1579_v12  ;;  %1594 = vmatpush.msra.mxu2 %v1578_v19  ;;  %v1552_v51 = vld [vmem:[%s4077_s13 + $0x38] sm:$0xff]  ;;  %v1547_v19 = vld [vmem:[%s4077_s13 + $0x10] sm:$0xff] }
 0x1ff   : > { %v1568_v12 = vld [vmem:[%s4077_s13 + $0xb8] sm:$0xff] }
 0x200   : > { %2453 = vmatmul.msk.f32.vlgmr.msra.gmra.mxu3 %vm1220_vm6, %v1191_v4  ;;  %2454 = vmatmul.msk.f32.vlgmr.msra.gmra.mxu1 %vm1220_vm6, %v1191_v4 }
 0x201   : > { %1507 = vmatpush.msra.mxu3 %v1374_v5  ;;  %1527 = vmatpush.msra.mxu1 %v1375_v6  ;;  %v1586_v5 = vld [vmem:[%s4077_s13 + $0x148] sm:$0xff]  ;;  %v1583_v6 = vld [vmem:[%s4077_s13 + $0x130] sm:$0xff] }
 0x202   : > { %1615 = vmatpush.msra.mxu0 %v1576_v20  ;;  %1595 = vmatpush.msra.mxu2 %v1575_v23  ;;  %v3511_v23 = vld [vmem:[%s4078_s14] sm:$0x7] }
 0x203   : > { %1508 = vmatpush.msra.mxu3 %v1371_v9  ;;  %1528 = vmatpush.msra.mxu1 %v1372_v10  ;;  %v1577_v9 = vld [vmem:[%s4077_s13 + $0x100] sm:$0xff]  ;;  %v1574_v10 = vld [vmem:[%s4077_s13 + $0xe8] sm:$0xff] }
 0x204   : > { %1616 = vmatpush.msra.mxu0 %v1573_v24  ;;  %1596 = vmatpush.msra.mxu2 %v1572_v27  ;;  %v1655_v27 = vperm.slane %v3511_v23, 0 }
 0x205   : > { %1509 = vmatpush.msra.mxu3 %v1368_v13  ;;  %1529 = vmatpush.msra.mxu1 %v1369_v18  ;;  %v1565_v13 = vld [vmem:[%s4077_s13 + $0xa0] sm:$0xff]  ;;  %v1550_v18 = vld [vmem:[%s4077_s13 + $0x28] sm:$0xff] }
 0x206   : > { %1617 = vmatpush.msra.mxu0 %v1570_v28  ;;  %1597 = vmatpush.msra.mxu2 %v1569_v31 }
 0x207   : > { %1510 = vmatpush.msra.mxu3 %v1365_v14  ;;  %1530 = vmatpush.msra.mxu1 %v1366_v22  ;;  %v1562_v14 = vld [vmem:[%s4077_s13 + $0x88] sm:$0xff] }
 0x208   : > { %1618 = vmatpush.msra.mxu0 %v1567_v32  ;;  %1598 = vmatpush.msra.mxu2 %v1566_v35  ;;  %v1844_v35 = vld [vmem:[%s4081_s17 + $0x130] sm:$0xff] }
 0x209   : > { %1511 = vmatpush.msra.mxu3 %v1362_v15  ;;  %1531 = vmatpush.msra.mxu1 %v1363_v26  ;;  %v1559_v15 = vld [vmem:[%s4077_s13 + $0x70] sm:$0xff] }
 0x20a   : > { %1619 = vmatpush.msra.mxu0 %v1564_v36  ;;  %1599 = vmatpush.msra.mxu2 %v1563_v39  ;;  %v1821_v39 = vld [vmem:[%s4081_s17 + $0x78] sm:$0xff] }
 0x20b   : > { %1512 = vmatpush.msra.mxu3 %v1359_v16  ;;  %1532 = vmatpush.msra.mxu1 %v1360_v30  ;;  %v1556_v16 = vld [vmem:[%s4077_s13 + $0x58] sm:$0xff] }
 0x20c   : > { %1620 = vmatpush.msra.mxu0 %v1561_v40  ;;  %1600 = vmatpush.msra.mxu2 %v1560_v43  ;;  %v1843_v40 = vld [vmem:[%s4081_s17 + $0x128] sm:$0xff]  ;;  %v1842_v43 = vld [vmem:[%s4081_s17 + $0x120] sm:$0xff] }
 0x20d   : > { %1513 = vmatpush.msra.mxu3 %v1356_v17  ;;  %1533 = vmatpush.msra.mxu1 %v1357_v34  ;;  %v1553_v17 = vld [vmem:[%s4077_s13 + $0x40] sm:$0xff] }
 0x20e   : > { %1621 = vmatpush.msra.mxu0 %v1558_v44  ;;  %1601 = vmatpush.msra.mxu2 %v1557_v47  ;;  %v1836_v44 = vld [vmem:[%s4081_s17 + $0xf0] sm:$0xff]  ;;  %v1835_v47 = vld [vmem:[%s4081_s17 + $0xe8] sm:$0xff] }
 0x20f   : > { %1514 = vmatpush.msra.mxu3 %v1353_v21  ;;  %1534 = vmatpush.msra.mxu1 %v1354_v38  ;;  %v3525_v38 = vld [vmem:[%s4079_s15] sm:$0x3] }
 0x210   : > { %1622 = vmatpush.msra.mxu0 %v1555_v48  ;;  %1602 = vmatpush.msra.mxu2 %v1554_v50  ;;  %v1818_v48 = vld [vmem:[%s4081_s17 + $0x60] sm:$0xff] }
 0x211   : > { %1515 = vmatpush.msra.mxu3 %v1350_v25  ;;  %1535 = vmatpush.msra.mxu1 %v1351_v42  ;;  %v1820_v42 = vld [vmem:[%s4081_s17 + $0x70] sm:$0xff]  ;;  %v1739_v50 = vld [vmem:[%s4080_s16] sm:$0x3] }
 0x212   : > { %1623 = vmatpush.msra.mxu0 %v1552_v51  ;;  %1603 = vmatpush.msra.mxu2 %v1551_v53  ;;  %v1817_v51 = vld [vmem:[%s4081_s17 + $0x58] sm:$0xff]  ;;  %v1834_v53 = vld [vmem:[%s4081_s17 + $0xe0] sm:$0xff] }
 0x213   : > { %1516 = vmatpush.msra.mxu3 %v1347_v29  ;;  %1536 = vmatpush.msra.mxu1 %v1348_v46  ;;  %v1656_v29 = vperm.slane %v3511_v23, 1  ;;  %v1841_v46 = vld [vmem:[%s4081_s17 + $0x118] sm:$0xff] }
 0x214   : > { %1624 = vmatpush.msra.mxu0 %v1549_v54  ;;  %1604 = vmatpush.msra.mxu2 %v1548_v56  ;;  %v1838_v56 = vld [vmem:[%s4081_s17 + $0x100] sm:$0xff] }
 0x215   : > { %1517 = vmatpush.msra.mxu3 %v1344_v33  ;;  %1537 = vmatpush.msra.mxu1 %v1345_v49  ;;  %v1845_v33 = vld [vmem:[%s4081_s17 + $0x138] sm:$0xff]  ;;  %v1840_v49 = vld [vmem:[%s4081_s17 + $0x110] sm:$0xff] }
 0x216   : > { %1625 = vmatpush.msra.mxu0 %v1546_v57  ;;  %1605 = vmatpush.msra.mxu2 %v1545_v59  ;;  %v1833_v57 = vld [vmem:[%s4081_s17 + $0xd8] sm:$0xff] }
 0x217   : > { %1518 = vmatpush.msra.mxu3 %v1341_v37  ;;  %1538 = vmatpush.msra.mxu1 %v1342_v52  ;;  %v1839_v52 = vld [vmem:[%s4081_s17 + $0x108] sm:$0xff]  ;;  %v1941_v59 = vld [vmem:[%s4082_s18 + $0xf8] sm:$0xff] }
 0x219   : > { %1519 = vmatpush.msra.mxu3 %v1338_v41  ;;  %1539 = vmatpush.msra.mxu1 %v1339_v55  ;;  %v1837_v41 = vld [vmem:[%s4081_s17 + $0xf8] sm:$0xff]  ;;  %v1816_v55 = vld [vmem:[%s4081_s17 + $0x50] sm:$0xff] }
 0x21b   : > { %1520 = vmatpush.msra.mxu3 %v1335_v45  ;;  %1540 = vmatpush.msra.mxu1 %v1336_v58  ;;  %v1819_v45 = vld [vmem:[%s4081_s17 + $0x68] sm:$0xff] }
 0x21c   : > { %v1815_v58 = vld [vmem:[%s4081_s17 + $0x48] sm:$0xff] }
 0x276   : > { %v1309_v60 = vpop.f32.mrf.mxu0 }
 0x27c   : > { %v1241_v62 = vpop.f32.mrf.mxu2 }
 0x27d   : > { %v1329_v61 = vpop.f32.mrf.mxu1 }
 0x27e   : > { %v1330_v0 = vadd.f32 %v1329_v61, %v1309_v60  ;;  %v1657_v61 = vperm.slane %v3511_v23, 2  ;;  %v1920_v23 = vld [vmem:[%s4082_s18 + $0x50] sm:$0xff] }
 0x283   : > { %v1261_v63 = vpop.f32.mrf.mxu3 }
 0x284   : > { %v1262_v1 = vadd.f32 %v1261_v63, %v1241_v62  ;;  %v1832_v62 = vld [vmem:[%s4081_s17 + $0xd0] sm:$0xff] }
 0x286   : > { %v1332_v2 = vmax.f32 %v1262_v1, %v1330_v0  ;;  %v1814_v0 = vld [vmem:[%s4081_s17 + $0x40] sm:$0xff]  ;;  %v1940_v1 = vld [vmem:[%s4082_s18 + $0xf0] sm:$0xff] }
 0x288   : > { %v1333_v3 = vmax.f32 %v1332_v2, 0.0 }
 0x28a   : > { %2458 = vmatmul.msk.f32.vlgmr.msrb.gmra.mxu0 %vm1420_vm7, %v1333_v3  ;;  %v1419_v4 = vrot.slane %v1333_v3, 1  ;;  %v1587_v8 = vrot.slane %v1333_v3, 2 }
 0x28c   : > { %2455 = vmatmul.msk.f32.vlgmr.msrb.gmra.mxu3 %vm1420_vm7, %v1419_v4  ;;  %2456 = vmatmul.msk.f32.vlgmr.msrb.gmra.mxu1 %vm1420_vm7, %v1419_v4 }
 0x28d   : > { %2457 = vmatmul.msk.f32.vlgmr.msrb.gmra.mxu2 %vm1420_vm7, %v1419_v4  ;;  %1632 = vmatpush.msrb.mxu3 %v1586_v5  ;;  %v1813_v4 = vld [vmem:[%s4081_s17 + $0x38] sm:$0xff] }
 0x28f   : > { %1633 = vmatpush.msrb.mxu3 %v1583_v6  ;;  %v1939_v6 = vld [vmem:[%s4082_s18 + $0xe8] sm:$0xff] }
 0x291   : > { %1634 = vmatpush.msrb.mxu3 %v1580_v7  ;;  %v1812_v7 = vld [vmem:[%s4081_s17 + $0x30] sm:$0xff] }
 0x292   : > { %2462 = vmatmul.msk.f32.vlgmr.msra.gmra.mxu0 %vm1420_vm7, %v1587_v8 }
 0x293   : > { %1635 = vmatpush.msrb.mxu3 %v1577_v9  ;;  %v1938_v9 = vld [vmem:[%s4082_s18 + $0xe0] sm:$0xff] }
 0x294   : > { %2459 = vmatmul.msk.f32.vlgmr.msra.gmra.mxu3 %vm1420_vm7, %v1333_v3  ;;  %2460 = vmatmul.msk.f32.vlgmr.msra.gmra.mxu1 %vm1420_vm7, %v1333_v3  ;;  %v1831_v3 = vld [vmem:[%s4081_s17 + $0xc8] sm:$0xff] }
 0x295   : > { %2461 = vmatmul.msk.f32.vlgmr.msra.gmra.mxu2 %vm1420_vm7, %v1587_v8  ;;  %1636 = vmatpush.msrb.mxu3 %v1574_v10  ;;  %v1811_v10 = vld [vmem:[%s4081_s17 + $0x28] sm:$0xff] }
 0x297   : > { %1637 = vmatpush.msrb.mxu3 %v1571_v11  ;;  %v1924_v11 = vld [vmem:[%s4082_s18 + $0x70] sm:$0xff] }
 0x299   : > { %1638 = vmatpush.msrb.mxu3 %v1568_v12  ;;  %v1937_v12 = vld [vmem:[%s4082_s18 + $0xd8] sm:$0xff] }
 0x29b   : > { %1639 = vmatpush.msrb.mxu3 %v1565_v13  ;;  %v1810_v13 = vld [vmem:[%s4081_s17 + $0x20] sm:$0xff] }
 0x29d   : > { %1640 = vmatpush.msrb.mxu3 %v1562_v14  ;;  %v1809_v14 = vld [vmem:[%s4081_s17 + $0x18] sm:$0xff] }
 0x29f   : > { %1641 = vmatpush.msrb.mxu3 %v1559_v15  ;;  %v1808_v15 = vld [vmem:[%s4081_s17 + $0x10] sm:$0xff] }
 0x2a1   : > { %1642 = vmatpush.msrb.mxu3 %v1556_v16  ;;  %v1830_v16 = vld [vmem:[%s4081_s17 + $0xc0] sm:$0xff] }
 0x2a3   : > { %1643 = vmatpush.msrb.mxu3 %v1553_v17  ;;  %v1923_v17 = vld [vmem:[%s4082_s18 + $0x68] sm:$0xff] }
 0x2a5   : > { %1644 = vmatpush.msrb.mxu3 %v1550_v18  ;;  %v1807_v18 = vld [vmem:[%s4081_s17 + $0x8] sm:$0xff] }
 0x2a7   : > { %1645 = vmatpush.msrb.mxu3 %v1547_v19  ;;  %v1936_v19 = vld [vmem:[%s4082_s18 + $0xd0] sm:$0xff] }
 0x2a8   : > { %2463 = vmatmul.msk.f32.vlgmr.msrb.gmra.mxu3 %vm1420_vm7, %v1587_v8  ;;  %v1925_v8 = vld [vmem:[%s4082_s18 + $0x78] sm:$0xff] }
 0x2a9   : > { %1898 = vmatpush.msra.mxu3 %v1845_v33  ;;  %v1825_v33 = vld [vmem:[%s4081_s17 + $0x98] sm:$0xff] }
 0x2ab   : > { %1899 = vmatpush.msra.mxu3 %v1844_v35  ;;  %v1935_v35 = vld [vmem:[%s4082_s18 + $0xc8] sm:$0xff] }
 0x2ad   : > { %1900 = vmatpush.msra.mxu3 %v1843_v40  ;;  %v1824_v40 = vld [vmem:[%s4081_s17 + $0x90] sm:$0xff] }
 0x2af   : > { %1901 = vmatpush.msra.mxu3 %v1842_v43  ;;  %v1914_v43 = vld [vmem:[%s4082_s18 + $0x20] sm:$0xff] }
 0x2b1   : > { %1902 = vmatpush.msra.mxu3 %v1841_v46  ;;  %v1822_v46 = vld [vmem:[%s4081_s17 + $0x80] sm:$0xff] }
 0x2b3   : > { %1903 = vmatpush.msra.mxu3 %v1840_v49  ;;  %v1912_v49 = vld [vmem:[%s4082_s18 + $0x10] sm:$0xff] }
 0x2b5   : > { %1904 = vmatpush.msra.mxu3 %v1839_v52  ;;  %v1930_v52 = vld [vmem:[%s4082_s18 + $0xa0] sm:$0xff] }
 0x2b7   : > { %1905 = vmatpush.msra.mxu3 %v1838_v56  ;;  %v1910_v56 = vld [vmem:[%s4082_s18] sm:$0xff] }
 0x2b9   : > { %1970 = vmatpush.msrb.mxu3 %v1941_v59  ;;  %v1927_v59 = vld [vmem:[%s4082_s18 + $0x88] sm:$0xff] }
 0x2bb   : > { %1971 = vmatpush.msrb.mxu3 %v1940_v1  ;;  %v2073_v1 = vld [vmem:[%s4084_s20 + $0xe8] sm:$0xff] }
 0x2bd   : > { %1972 = vmatpush.msrb.mxu3 %v1939_v6  ;;  %v2038_v6 = vld [vmem:[%s4083_s19 + $0xd0] sm:$0xff] }
 0x2bf   : > { %1973 = vmatpush.msrb.mxu3 %v1938_v9 }
 0x2c1   : > { %1974 = vmatpush.msrb.mxu3 %v1937_v12  ;;  %v2043_v12 = vld [vmem:[%s4083_s19 + $0xf8] sm:$0xff] }
 0x2c3   : > { %1975 = vmatpush.msrb.mxu3 %v1936_v19  ;;  %v2068_v19 = vld [vmem:[%s4084_s20 + $0xc0] sm:$0xff] }
 0x2c5   : > { %1976 = vmatpush.msrb.mxu3 %v1935_v35  ;;  %v2060_v35 = vld [vmem:[%s4084_s20 + $0x80] sm:$0xff] }
 0x307   : > { %v1502_v20 = vpop.f32.mrf.mxu0 }
 0x309   : > { %v1460_v24 = vpop.f32.mrf.mxu1 }
 0x30f   : > { %v1440_v21 = vpop.f32.mrf.mxu3  ;;  %v1627_v31 = vpop.f32.mrf.mxu0 }
 0x310   : > { %v3506_v22 = vpop.f32.mrf.mxu2  ;;  %v1503_v25 = vadd.f32 %v1502_v20, %v1440_v21  ;;  %v1829_v20 = vld [vmem:[%s4081_s17 + $0xb8] sm:$0xff]  ;;  %v1922_v21 = vld [vmem:[%s4082_s18 + $0x60] sm:$0xff] }
 0x311   : > { %v1542_v54 = vpop.f32.mrf.mxu1 }
 0x312   : > { %v1543_v60 = vadd.f32 %v1542_v54, %v3506_v22  ;;  %v1921_v22 = vld [vmem:[%s4082_s18 + $0x58] sm:$0xff]  ;;  %v1942_v54 = vld [vmem:[%s4082_s18 + $0x100] sm:$0xff] }
 0x317   : > { %v1522_v26 = vpop.f32.mrf.mxu3 }
 0x318   : > { %v1523_v28 = vadd.f32 %v1522_v26, %v1460_v24  ;;  %v1607_v30 = vpop.f32.mrf.mxu2  ;;  %v1828_v24 = vld [vmem:[%s4081_s17 + $0xb0] sm:$0xff]  ;;  %v1827_v26 = vld [vmem:[%s4081_s17 + $0xa8] sm:$0xff] }
 0x319   : > { %v1650_v32 = vadd.f32 %v1607_v30, %v1503_v25  ;;  %v1919_v25 = vld [vmem:[%s4082_s18 + $0x48] sm:$0xff]  ;;  %v1826_v30 = vld [vmem:[%s4081_s17 + $0xa0] sm:$0xff] }
 0x31a   : > { %v1651_v34 = vadd.f32 %v1627_v31, %v1523_v28  ;;  %v1806_v28 = vld [vmem:[%s4081_s17] sm:$0xff]  ;;  %v1917_v31 = vld [vmem:[%s4082_s18 + $0x38] sm:$0xff] }
 0x31b   : > { %v1661_v36 = vadd.f32 %v1655_v27, %v1650_v32  ;;  %v1918_v27 = vld [vmem:[%s4082_s18 + $0x40] sm:$0xff]  ;;  %v1948_v32 = vld [vmem:[%s4082_s18 + $0x130] sm:$0xff] }
 0x31c   : > { %v1662_v37 = vadd.f32 %v1656_v29, %v1651_v34  ;;  %v1949_v29 = vld [vmem:[%s4082_s18 + $0x138] sm:$0xff]  ;;  %v1916_v34 = vld [vmem:[%s4082_s18 + $0x30] sm:$0xff] }
 0x31d   : > { %2464 = vmatpush.msk.msrb.mxu1 %vm1669_vm8, %v1661_v36 }
 0x31e   : > { %2466 = vmatpush.msk.msrb.mxu2 %vm1669_vm8, %v1662_v37  ;;  %2465 = vmatmul.msk.f32.vlgmr.msrb.gmra.mxu1 %vm1665_vm9, %v3525_v38 }
 0x31f   : > { %2470 = vmatpush.msk.msra.mxu1 %vm1669_vm8, %v1661_v36  ;;  %2467 = vmatmul.msk.f32.vlgmr.msrb.gmra.mxu2 %vm1665_vm9, %v3525_v38  ;;  %v1934_v36 = vld [vmem:[%s4082_s18 + $0xc0] sm:$0xff] }
 0x320   : > { %2472 = vmatpush.msk.msra.mxu2 %vm1669_vm8, %v1662_v37  ;;  %v1933_v37 = vld [vmem:[%s4082_s18 + $0xb8] sm:$0xff]  ;;  %1977 = vmatpush.msrb.mxu3 %v1934_v36  ;;  %v2061_v36 = vld [vmem:[%s4084_s20 + $0x88] sm:$0xff] }
 0x321   : > { %1850 = vmatpush.msrb.mxu1 %v1821_v39  ;;  %v1946_v39 = vld [vmem:[%s4082_s18 + $0x120] sm:$0xff] }
 0x322   : > { %1870 = vmatpush.msrb.mxu2 %v1837_v41  ;;  %v1823_v41 = vld [vmem:[%s4081_s17 + $0x88] sm:$0xff]  ;;  %1978 = vmatpush.msrb.mxu3 %v1933_v37  ;;  %v2026_v37 = vld [vmem:[%s4083_s19 + $0x70] sm:$0xff] }
 0x323   : > { %1851 = vmatpush.msrb.mxu1 %v1820_v42  ;;  %v1915_v42 = vld [vmem:[%s4082_s18 + $0x28] sm:$0xff] }
 0x324   : > { %1871 = vmatpush.msrb.mxu2 %v1836_v44  ;;  %v1932_v44 = vld [vmem:[%s4082_s18 + $0xb0] sm:$0xff] }
 0x325   : > { %1852 = vmatpush.msrb.mxu1 %v1819_v45  ;;  %v1945_v45 = vld [vmem:[%s4082_s18 + $0x118] sm:$0xff]  ;;  %1979 = vmatpush.msrb.mxu3 %v1932_v44  ;;  %v2057_v44 = vld [vmem:[%s4084_s20 + $0x68] sm:$0xff] }
 0x326   : > { %1872 = vmatpush.msrb.mxu2 %v1835_v47  ;;  %2471 = vmatmul.msk.f32.vlgmr.msra.gmra.mxu1 %vm1665_vm9, %v1739_v50  ;;  %v1913_v47 = vld [vmem:[%s4082_s18 + $0x18] sm:$0xff] }
 0x327   : > { %1853 = vmatpush.msrb.mxu1 %v1818_v48  ;;  %2473 = vmatmul.msk.f32.vlgmr.msra.gmra.mxu2 %vm1665_vm9, %v1739_v50  ;;  %v1944_v48 = vld [vmem:[%s4082_s18 + $0x110] sm:$0xff] }
 0x328   : > { %1873 = vmatpush.msrb.mxu2 %v1834_v53  ;;  %v1911_v53 = vld [vmem:[%s4082_s18 + $0x8] sm:$0xff] }
 0x329   : > { %1854 = vmatpush.msrb.mxu1 %v1817_v51  ;;  %v1943_v51 = vld [vmem:[%s4082_s18 + $0x108] sm:$0xff] }
 0x32a   : > { %1874 = vmatpush.msrb.mxu2 %v1833_v57  ;;  %v1928_v57 = vld [vmem:[%s4082_s18 + $0x90] sm:$0xff] }
 0x32b   : > { %1855 = vmatpush.msrb.mxu1 %v1816_v55  ;;  %v1647_v63 = vpop.f32.mrf.mxu3  ;;  %v1929_v55 = vld [vmem:[%s4082_s18 + $0x98] sm:$0xff] }
 0x32c   : > { %v1652_v2 = vadd.f32 %v1647_v63, %v1543_v60  ;;  %1875 = vmatpush.msrb.mxu2 %v1832_v62  ;;  %v1926_v60 = vld [vmem:[%s4082_s18 + $0x80] sm:$0xff]  ;;  %v2075_v62 = vld [vmem:[%s4084_s20 + $0xf8] sm:$0xff] }
 0x32d   : > { %1856 = vmatpush.msrb.mxu1 %v1815_v58 }
 0x32e   : > { %v1663_v5 = vadd.f32 %v1657_v61, %v1652_v2  ;;  %1876 = vmatpush.msrb.mxu2 %v1831_v3  ;;  %v2074_v61 = vld [vmem:[%s4084_s20 + $0xf0] sm:$0xff] }
 0x32f   : > { %1857 = vmatpush.msrb.mxu1 %v1814_v0  ;;  %v2072_v0 = vld [vmem:[%s4084_s20 + $0xe0] sm:$0xff] }
 0x330   : > { %2468 = vmatpush.msk.msrb.mxu0 %vm1669_vm8, %v1663_v5  ;;  %1877 = vmatpush.msrb.mxu2 %v1830_v16  ;;  %v2071_v16 = vld [vmem:[%s4084_s20 + $0xd8] sm:$0xff] }
 0x331   : > { %1858 = vmatpush.msrb.mxu1 %v1813_v4  ;;  %2469 = vmatmul.msk.f32.vlgmr.msrb.gmra.mxu0 %vm1665_vm9, %v3525_v38  ;;  %v1947_v38 = vld [vmem:[%s4082_s18 + $0x128] sm:$0xff]  ;;  %v2042_v4 = vld [vmem:[%s4083_s19 + $0xf0] sm:$0xff] }
 0x332   : > { %2474 = vmatpush.msk.msra.mxu0 %vm1669_vm8, %v1663_v5  ;;  %1878 = vmatpush.msrb.mxu2 %v1829_v20  ;;  %v2040_v5 = vld [vmem:[%s4083_s19 + $0xe0] sm:$0xff]  ;;  %v2069_v20 = vld [vmem:[%s4084_s20 + $0xc8] sm:$0xff] }
 0x333   : > { %1859 = vmatpush.msrb.mxu1 %v1812_v7 }
 0x334   : > { %1950 = vmatpush.msrb.mxu0 %v1925_v8  ;;  %1879 = vmatpush.msrb.mxu2 %v1828_v24  ;;  %v2067_v24 = vld [vmem:[%s4084_s20 + $0xb8] sm:$0xff] }
 0x335   : > { %1860 = vmatpush.msrb.mxu1 %v1811_v10 }
 0x336   : > { %1951 = vmatpush.msrb.mxu0 %v1924_v11  ;;  %1880 = vmatpush.msrb.mxu2 %v1827_v26  ;;  %v2033_v26 = vld [vmem:[%s4083_s19 + $0xa8] sm:$0xff] }
 0x337   : > { %1861 = vmatpush.msrb.mxu1 %v1810_v13  ;;  %v2041_v13 = vld [vmem:[%s4083_s19 + $0xe8] sm:$0xff] }
 0x338   : > { %1952 = vmatpush.msrb.mxu0 %v1923_v17  ;;  %1881 = vmatpush.msrb.mxu2 %v1826_v30  ;;  %v2036_v17 = vld [vmem:[%s4083_s19 + $0xc0] sm:$0xff]  ;;  %v2031_v30 = vld [vmem:[%s4083_s19 + $0x98] sm:$0xff] }
 0x339   : > { %1862 = vmatpush.msrb.mxu1 %v1809_v14  ;;  %2475 = vmatmul.msk.f32.vlgmr.msra.gmra.mxu0 %vm1665_vm9, %v1739_v50  ;;  %v1931_v50 = vld [vmem:[%s4082_s18 + $0xa8] sm:$0xff]  ;;  %v2039_v14 = vld [vmem:[%s4083_s19 + $0xd8] sm:$0xff] }
 0x33a   : > { %1953 = vmatpush.msrb.mxu0 %v1922_v21  ;;  %1882 = vmatpush.msrb.mxu2 %v1825_v33  ;;  %v2034_v21 = vld [vmem:[%s4083_s19 + $0xb0] sm:$0xff]  ;;  %v2028_v33 = vld [vmem:[%s4083_s19 + $0x80] sm:$0xff] }
 0x33b   : > { %1863 = vmatpush.msrb.mxu1 %v1808_v15  ;;  %1980 = vmatpush.msrb.mxu3 %v1931_v50  ;;  %v2070_v15 = vld [vmem:[%s4084_s20 + $0xd0] sm:$0xff]  ;;  %v2021_v50 = vld [vmem:[%s4083_s19 + $0x48] sm:$0xff] }
 0x33c   : > { %1954 = vmatpush.msrb.mxu0 %v1921_v22  ;;  %1883 = vmatpush.msrb.mxu2 %v1824_v40  ;;  %v2035_v22 = vld [vmem:[%s4083_s19 + $0xb8] sm:$0xff] }
 0x33d   : > { %1864 = vmatpush.msrb.mxu1 %v1807_v18  ;;  %1981 = vmatpush.msrb.mxu3 %v1930_v52  ;;  %v2037_v18 = vld [vmem:[%s4083_s19 + $0xc8] sm:$0xff]  ;;  %v2059_v40 = vld [vmem:[%s4084_s20 + $0x78] sm:$0xff] }
 0x33e   : > { %1955 = vmatpush.msrb.mxu0 %v1920_v23  ;;  %1884 = vmatpush.msrb.mxu2 %v1823_v41  ;;  %v2066_v23 = vld [vmem:[%s4084_s20 + $0xb0] sm:$0xff]  ;;  %v2024_v41 = vld [vmem:[%s4083_s19 + $0x60] sm:$0xff]  ;;  %v2053_v52 = vld [vmem:[%s4084_s20 + $0x48] sm:$0xff] }
 0x33f   : > { %1865 = vmatpush.msrb.mxu1 %v1806_v28  ;;  %1982 = vmatpush.msrb.mxu3 %v1929_v55  ;;  %v2065_v28 = vld [vmem:[%s4084_s20 + $0xa8] sm:$0xff]  ;;  %v2050_v55 = vld [vmem:[%s4084_s20 + $0x30] sm:$0xff] }
 0x340   : > { %1956 = vmatpush.msrb.mxu0 %v1919_v25  ;;  %1885 = vmatpush.msrb.mxu2 %v1822_v46  ;;  %v2032_v25 = vld [vmem:[%s4083_s19 + $0xa0] sm:$0xff]  ;;  %v2023_v46 = vld [vmem:[%s4083_s19 + $0x58] sm:$0xff] }
 0x341   : > { %1998 = vmatpush.msra.mxu1 %v1949_v29  ;;  %1983 = vmatpush.msrb.mxu3 %v1928_v57  ;;  %v2030_v29 = vld [vmem:[%s4083_s19 + $0x90] sm:$0xff]  ;;  %v2016_v57 = vld [vmem:[%s4083_s19 + $0x20] sm:$0xff] }
 0x342   : > { %1957 = vmatpush.msrb.mxu0 %v1918_v27  ;;  %2079 = vmatpush.msra.mxu2 %v2074_v61  ;;  %v2064_v27 = vld [vmem:[%s4084_s20 + $0xa0] sm:$0xff]  ;;  %v2014_v61 = vld [vmem:[%s4083_s19 + $0x10] sm:$0xff] }
 0x343   : > { %1999 = vmatpush.msra.mxu1 %v1948_v32  ;;  %1984 = vmatpush.msrb.mxu3 %v1927_v59  ;;  %v2063_v32 = vld [vmem:[%s4084_s20 + $0x98] sm:$0xff]  ;;  %v2048_v59 = vld [vmem:[%s4084_s20 + $0x20] sm:$0xff] }
 0x344   : > { %1958 = vmatpush.msrb.mxu0 %v1917_v31  ;;  %2080 = vmatpush.msra.mxu2 %v2072_v0  ;;  %v2062_v31 = vld [vmem:[%s4084_s20 + $0x90] sm:$0xff]  ;;  %v2047_v0 = vld [vmem:[%s4084_s20 + $0x18] sm:$0xff] }
 0x345   : > { %2000 = vmatpush.msra.mxu1 %v1947_v38  ;;  %1985 = vmatpush.msrb.mxu3 %v1926_v60  ;;  %v2027_v38 = vld [vmem:[%s4083_s19 + $0x78] sm:$0xff]  ;;  %v2049_v60 = vld [vmem:[%s4084_s20 + $0x28] sm:$0xff] }
 0x346   : > { %1959 = vmatpush.msrb.mxu0 %v1916_v34  ;;  %2081 = vmatpush.msra.mxu2 %v2070_v15  ;;  %v2029_v34 = vld [vmem:[%s4083_s19 + $0x88] sm:$0xff]  ;;  %v2195_v15 = vld [vmem:[#allocation8 + $0xd0] sm:$0xff] }
 0x347   : > { %2001 = vmatpush.msra.mxu1 %v1946_v39  ;;  %v2058_v39 = vld [vmem:[%s4084_s20 + $0x70] sm:$0xff] }
 0x348   : > { %1960 = vmatpush.msrb.mxu0 %v1915_v42  ;;  %2082 = vmatpush.msra.mxu2 %v2068_v19  ;;  %v2025_v42 = vld [vmem:[%s4083_s19 + $0x68] sm:$0xff]  ;;  %v2193_v19 = vld [vmem:[#allocation8 + $0xc0] sm:$0xff] }
 0x349   : > { %2002 = vmatpush.msra.mxu1 %v1945_v45  ;;  %v2022_v45 = vld [vmem:[%s4083_s19 + $0x50] sm:$0xff] }
 0x34a   : > { %1961 = vmatpush.msrb.mxu0 %v1914_v43  ;;  %2083 = vmatpush.msra.mxu2 %v2066_v23  ;;  %v2056_v43 = vld [vmem:[%s4084_s20 + $0x60] sm:$0xff]  ;;  %v2192_v23 = vld [vmem:[#allocation8 + $0xb8] sm:$0xff] }
 0x34b   : > { %2003 = vmatpush.msra.mxu1 %v1944_v48  ;;  %v2055_v48 = vld [vmem:[%s4084_s20 + $0x58] sm:$0xff] }
 0x34c   : > { %1962 = vmatpush.msrb.mxu0 %v1913_v47  ;;  %2084 = vmatpush.msra.mxu2 %v2064_v27  ;;  %v2054_v47 = vld [vmem:[%s4084_s20 + $0x50] sm:$0xff] }
 0x34d   : > { %2004 = vmatpush.msra.mxu1 %v1943_v51  ;;  %v2052_v51 = vld [vmem:[%s4084_s20 + $0x40] sm:$0xff] }
 0x34e   : > { %1963 = vmatpush.msrb.mxu0 %v1912_v49  ;;  %2085 = vmatpush.msra.mxu2 %v2062_v31  ;;  %v2020_v49 = vld [vmem:[%s4083_s19 + $0x40] sm:$0xff] }
 0x34f   : > { %2005 = vmatpush.msra.mxu1 %v1942_v54  ;;  %v2019_v54 = vld [vmem:[%s4083_s19 + $0x38] sm:$0xff] }
 0x350   : > { %1964 = vmatpush.msrb.mxu0 %v1911_v53  ;;  %2086 = vmatpush.msra.mxu2 %v2060_v35  ;;  %v2018_v53 = vld [vmem:[%s4083_s19 + $0x30] sm:$0xff]  ;;  %v2176_v35 = vld [vmem:[#allocation8 + $0x38] sm:$0xff] }
 0x352   : > { %1965 = vmatpush.msrb.mxu0 %v1910_v56  ;;  %2087 = vmatpush.msra.mxu2 %v2058_v39  ;;  %v2051_v56 = vld [vmem:[%s4084_s20 + $0x38] sm:$0xff]  ;;  %v2174_v39 = vld [vmem:[#allocation8 + $0x28] sm:$0xff] }
 0x354   : > { %2099 = vmatpush.msra.mxu0 %v2075_v62  ;;  %2088 = vmatpush.msra.mxu2 %v2056_v43  ;;  %v2015_v62 = vld [vmem:[%s4083_s19 + $0x18] sm:$0xff] }
 0x355   : > { %v2172_v43 = vld [vmem:[#allocation8 + $0x18] sm:$0xff] }
 0x356   : > { %2100 = vmatpush.msra.mxu0 %v2073_v1  ;;  %2089 = vmatpush.msra.mxu2 %v2054_v47  ;;  %v2012_v1 = vld [vmem:[%s4083_s19] sm:$0xff]  ;;  %v2170_v47 = vld [vmem:[#allocation8 + $0x8] sm:$0xff] }
 0x358   : > { %2101 = vmatpush.msra.mxu0 %v2071_v16  ;;  %2090 = vmatpush.msra.mxu2 %v2052_v51  ;;  %v2179_v16 = vld [vmem:[#allocation8 + $0x50] sm:$0xff] }
 0x359   : > { %v2257_v51 = vld [vmem:[%s4145_s10 + $0x70] sm:$0xff] }
 0x35a   : > { %2102 = vmatpush.msra.mxu0 %v2069_v20  ;;  %2091 = vmatpush.msra.mxu2 %v2050_v55  ;;  %v2177_v20 = vld [vmem:[#allocation8 + $0x40] sm:$0xff]  ;;  %v2253_v55 = vld [vmem:[%s4145_s10 + $0x50] sm:$0xff] }
 0x35c   : > { %2103 = vmatpush.msra.mxu0 %v2067_v24  ;;  %2092 = vmatpush.msra.mxu2 %v2048_v59 }
 0x35e   : > { %2104 = vmatpush.msra.mxu0 %v2065_v28 }
 0x360   : > { %2105 = vmatpush.msra.mxu0 %v2063_v32 }
 0x362   : > { %2106 = vmatpush.msra.mxu0 %v2061_v36  ;;  %v2191_v36 = vld [vmem:[#allocation8 + $0xb0] sm:$0xff] }
 0x364   : > { %2107 = vmatpush.msra.mxu0 %v2059_v40  ;;  %v2189_v40 = vld [vmem:[#allocation8 + $0xa0] sm:$0xff] }
 0x366   : > { %2108 = vmatpush.msra.mxu0 %v2057_v44  ;;  %v2187_v44 = vld [vmem:[#allocation8 + $0x90] sm:$0xff] }
 0x368   : > { %2109 = vmatpush.msra.mxu0 %v2055_v48  ;;  %v2185_v48 = vld [vmem:[#allocation8 + $0x80] sm:$0xff] }
 0x36a   : > { %2110 = vmatpush.msra.mxu0 %v2053_v52  ;;  %v2256_v52 = vld [vmem:[%s4145_s10 + $0x68] sm:$0xff] }
 0x36c   : > { %2111 = vmatpush.msra.mxu0 %v2051_v56  ;;  %v2252_v56 = vld [vmem:[%s4145_s10 + $0x48] sm:$0xff] }
 0x36e   : > { %2112 = vmatpush.msra.mxu0 %v2049_v60 }
 0x370   : > { %2113 = vmatpush.msra.mxu0 %v2047_v0 }
 0x39b   : > { %v1696_v58 = vpop.f32.mrf.mxu1 }
 0x3a2   : > { %v1716_v63 = vpop.f32.mrf.mxu2 }
 0x3a3   : > { %v1760_v2 = vpop.f32.mrf.mxu1 }
 0x3a4   : > { %v1803_v3 = vmax.f32 %v1696_v58, %v1760_v2  ;;  %v2017_v58 = vld [vmem:[%s4083_s19 + $0x28] sm:$0xff] }
 0x3a5   : > { %v2013_v2 = vld [vmem:[%s4083_s19 + $0x8] sm:$0xff] }
 0x3a6   : > { %1866 = vmatmul.f32.vlgmr.msrb.gmra.mxu1 %v1803_v3  ;;  %1966 = vmatmul.f32.vlgmr.msrb.gmra.mxu0 %v1803_v3  ;;  %v2044_v3 = vld [vmem:[%s4084_s20] sm:$0xff] }
 0x3a7   : > { %2119 = vmatpush.msrb.mxu1 %v2042_v4  ;;  %v2045_v4 = vld [vmem:[%s4084_s20 + $0x8] sm:$0xff] }
 0x3a8   : > { %2114 = vmatpush.msra.mxu0 %v2045_v4 }
 0x3a9   : > { %2120 = vmatpush.msrb.mxu1 %v2040_v5  ;;  %v2200_v5 = vld [vmem:[#allocation8 + $0xf8] sm:$0xff] }
 0x3aa   : > { %v1780_v7 = vpop.f32.mrf.mxu2  ;;  %2222 = vmatpush.msrb.mxu0 %v2200_v5 }
 0x3ab   : > { %v1804_v8 = vmax.f32 %v1716_v63, %v1780_v7  ;;  %2121 = vmatpush.msrb.mxu1 %v2038_v6  ;;  %v2046_v63 = vld [vmem:[%s4084_s20 + $0x10] sm:$0xff]  ;;  %v2184_v6 = vld [vmem:[#allocation8 + $0x78] sm:$0xff] }
 0x3ac   : > { %2093 = vmatpush.msra.mxu2 %v2046_v63  ;;  %v2199_v7 = vld [vmem:[#allocation8 + $0xf0] sm:$0xff] }
 0x3ad   : > { %1886 = vmatmul.f32.vlgmr.msrb.gmra.mxu2 %v1804_v8  ;;  %2122 = vmatpush.msrb.mxu1 %v2036_v17  ;;  %v2194_v17 = vld [vmem:[#allocation8 + $0xc8] sm:$0xff] }
 0x3ae   : > { %v1736_v9 = vpop.f32.mrf.mxu0  ;;  %2094 = vmatpush.msra.mxu2 %v2044_v3  ;;  %2223 = vmatpush.msrb.mxu0 %v2199_v7  ;;  %v2250_v7 = vld [vmem:[%s4145_s10 + $0x38] sm:$0xff] }
 0x3af   : > { %2123 = vmatpush.msrb.mxu1 %v2034_v21 }
 0x3b0   : > { %2202 = vmatpush.msrb.mxu2 %v2184_v6 }
 0x3b1   : > { %2124 = vmatpush.msrb.mxu1 %v2032_v25 }
 0x3b3   : > { %2125 = vmatpush.msrb.mxu1 %v2030_v29 }
 0x3b5   : > { %2126 = vmatpush.msrb.mxu1 %v2028_v33 }
 0x3b6   : > { %v1800_v10 = vpop.f32.mrf.mxu0 }
 0x3b7   : > { %v1805_v11 = vmax.f32 %v1736_v9, %v1800_v10  ;;  %2127 = vmatpush.msrb.mxu1 %v2026_v37  ;;  %v2198_v9 = vld [vmem:[#allocation8 + $0xe8] sm:$0xff]  ;;  %v2175_v37 = vld [vmem:[#allocation8 + $0x30] sm:$0xff] }
 0x3b8   : > { %v2182_v10 = vld [vmem:[#allocation8 + $0x68] sm:$0xff]  ;;  %2224 = vmatpush.msrb.mxu0 %v2198_v9 }
 0x3b9   : > { %2476 = vmatmul.msk.f32.vlgmr.msra.gmra.mxu3 %vm1846_vm10, %v1805_v11  ;;  %2477 = vmatmul.msk.f32.vlgmr.msra.gmra.mxu1 %vm1846_vm10, %v1805_v11  ;;  %v2197_v11 = vld [vmem:[#allocation8 + $0xe0] sm:$0xff]  ;;  %v2248_v9 = vld [vmem:[%s4145_s10 + $0x28] sm:$0xff] }
 0x3ba   : > { %2139 = vmatpush.msra.mxu3 %v2043_v12  ;;  %2128 = vmatpush.msrb.mxu1 %v2024_v41  ;;  %v2181_v12 = vld [vmem:[#allocation8 + $0x60] sm:$0xff] }
 0x3bb   : > { %2225 = vmatpush.msrb.mxu0 %v2197_v11  ;;  %v2173_v41 = vld [vmem:[#allocation8 + $0x20] sm:$0xff]  ;;  %v2246_v11 = vld [vmem:[%s4145_s10 + $0x18] sm:$0xff] }
 0x3bc   : > { %2140 = vmatpush.msra.mxu3 %v2041_v13  ;;  %2129 = vmatpush.msrb.mxu1 %v2022_v45  ;;  %v2196_v13 = vld [vmem:[#allocation8 + $0xd8] sm:$0xff]  ;;  %v2171_v45 = vld [vmem:[#allocation8 + $0x10] sm:$0xff] }
 0x3bd   : > { %2226 = vmatpush.msrb.mxu0 %v2196_v13  ;;  %v2244_v13 = vld [vmem:[%s4145_s10 + $0x8] sm:$0xff] }
 0x3be   : > { %2141 = vmatpush.msra.mxu3 %v2039_v14  ;;  %2130 = vmatpush.msrb.mxu1 %v2020_v49  ;;  %v2180_v14 = vld [vmem:[#allocation8 + $0x58] sm:$0xff]  ;;  %v2169_v49 = vld [vmem:[#allocation8] sm:$0xff] }
 0x3bf   : > { %2227 = vmatpush.msrb.mxu0 %v2195_v15  ;;  %v2201_v15 = vld [vmem:[%s4147_s27] sm:$0x1]  ;;  %s2307_s27 = scalar_lea.sflag [#allocation4], %s849_s23 }
 0x3c0   : > { %2142 = vmatpush.msra.mxu3 %v2037_v18  ;;  %2131 = vmatpush.msrb.mxu1 %v2018_v53  ;;  %v2178_v18 = vld [vmem:[#allocation8 + $0x48] sm:$0xff]  ;;  %v2255_v53 = vld [vmem:[%s4145_s10 + $0x60] sm:$0xff] }
 0x3c1   : > { %1986 = vmatmul.f32.vlgmr.msrb.gmra.mxu3 %v1804_v8  ;;  %v2183_v8 = vld [vmem:[#allocation8 + $0x70] sm:$0xff]  ;;  %2228 = vmatpush.msrb.mxu0 %v2194_v17 }
 0x3c2   : > { %2143 = vmatpush.msra.mxu3 %v2035_v22  ;;  %2132 = vmatpush.msrb.mxu1 %v2016_v57  ;;  %v2251_v57 = vld [vmem:[%s4145_s10 + $0x40] sm:$0xff] }
 0x3c3   : > { %2203 = vmatpush.msrb.mxu2 %v2183_v8  ;;  %2229 = vmatpush.msrb.mxu0 %v2193_v19  ;;  %v2249_v8 = vld [vmem:[%s4145_s10 + $0x30] sm:$0xff] }
 0x3c4   : > { %2144 = vmatpush.msra.mxu3 %v2033_v26  ;;  %2133 = vmatpush.msrb.mxu1 %v2014_v61 }
 0x3c5   : > { %2204 = vmatpush.msrb.mxu2 %v2182_v10  ;;  %2230 = vmatpush.msrb.mxu0 %v2192_v23  ;;  %v2247_v10 = vld [vmem:[%s4145_s10 + $0x20] sm:$0xff] }
 0x3c6   : > { %2145 = vmatpush.msra.mxu3 %v2031_v30  ;;  %2134 = vmatpush.msrb.mxu1 %v2012_v1 }
 0x3c7   : > { %2205 = vmatpush.msrb.mxu2 %v2181_v12  ;;  %2231 = vmatpush.msrb.mxu0 %v2191_v36  ;;  %v2245_v12 = vld [vmem:[%s4145_s10 + $0x10] sm:$0xff] }
 0x3c8   : > { %2146 = vmatpush.msra.mxu3 %v2029_v34 }
 0x3c9   : > { %2206 = vmatpush.msrb.mxu2 %v2180_v14  ;;  %v2243_v14 = vld [vmem:[%s4145_s10] sm:$0xff] }
 0x3ca   : > { %2147 = vmatpush.msra.mxu3 %v2027_v38  ;;  %v2190_v38 = vld [vmem:[#allocation8 + $0xa8] sm:$0xff] }
 0x3cb   : > { %2207 = vmatpush.msrb.mxu2 %v2179_v16  ;;  %2232 = vmatpush.msrb.mxu0 %v2190_v38 }
 0x3cc   : > { %2148 = vmatpush.msra.mxu3 %v2025_v42  ;;  %v2188_v42 = vld [vmem:[#allocation8 + $0x98] sm:$0xff] }
 0x3cd   : > { %2208 = vmatpush.msrb.mxu2 %v2178_v18  ;;  %2233 = vmatpush.msrb.mxu0 %v2189_v40 }
 0x3ce   : > { %2149 = vmatpush.msra.mxu3 %v2023_v46  ;;  %v2186_v46 = vld [vmem:[#allocation8 + $0x88] sm:$0xff] }
 0x3cf   : > { %2209 = vmatpush.msrb.mxu2 %v2177_v20  ;;  %2234 = vmatpush.msrb.mxu0 %v2188_v42 }
 0x3d0   : > { %2150 = vmatpush.msra.mxu3 %v2021_v50  ;;  %v2258_v50 = vld [vmem:[%s4144_s3 + $0x78] sm:$0xff]  ;;  %s2315_s3 = scalar_lea.hbm %s4150_s7, %s2930_s8 }
 0x3d1   : > { %2210 = vmatpush.msrb.mxu2 %v2176_v35  ;;  %2235 = vmatpush.msrb.mxu0 %v2187_v44  ;;  %s2319_s5 = sshll.u32 %s2315_s3, 4  ;;  %s2320_s5 = int_to_ptr.hbm [resolvable:$true] %s2319_s5 }
 0x3d2   : > { %2151 = vmatpush.msra.mxu3 %v2019_v54  ;;  %2260 = vmatpush.msra.mxu1 %v2258_v50  ;;  %v2254_v54 = vld [vmem:[%s4145_s10 + $0x58] sm:$0xff]  ;;  %s2704_s30 = sshra.s32 %s2320_s5, 4  ;;  %s2705_s30 = int_to_ptr.hbm [resolvable:$true] %s2704_s30 }
 0x3d3   : > { %2211 = vmatpush.msrb.mxu2 %v2175_v37  ;;  %2236 = vmatpush.msrb.mxu0 %v2186_v46  ;;  %s2706_s8 = scalar_lea.hbm %s2705_s30, 1 }
 0x3d4   : > { %2152 = vmatpush.msra.mxu3 %v2017_v58  ;;  %2261 = vmatpush.msra.mxu1 %v2257_v51  ;;  %v2159_v58 = vld [vmem:[%s4146_s6] sm:$0x3]  ;;  %s4151_s6 = smov %s4150_s7  ;;  %p2707_p0 = scmp.ne.s32.totalorder %s2705_s30, %s2706_s8 }
 0x3d5   : > { %2212 = vmatpush.msrb.mxu2 %v2174_v39  ;;  %2237 = vmatpush.msrb.mxu0 %v2185_v48  ;;  %v2162_v59 = vperm.slane %v2159_v58, 1  ;;  %v2161_v63 = vperm.slane %v2159_v58, 0  ;;  %s2710_s21 = scalar_lea.hbm %s4151_s6, 2  ;;  %p2711_p3 = scmp.lt.s32.totalorder %s2705_s30, %s4151_s6 }
 0x3d6   : > { %2153 = vmatpush.msra.mxu3 %v2015_v62  ;;  %2262 = vmatpush.msra.mxu1 %v2256_v52  ;;  %p2708_p1 = pnand %p2707_p0, %p2947_p5  ;;  %p2712_p4 = scmp.lt.s32.totalorder %s2710_s21, %s2706_s8 }
 0x3d7   : > { %2213 = vmatpush.msrb.mxu2 %v2173_v41 }
 0x3d8   : > { %2154 = vmatpush.msra.mxu3 %v2013_v2  ;;  %2263 = vmatpush.msra.mxu1 %v2255_v53  ;;  %p2709_p2 = pneg %p2708_p1  ;;  %p2713_p7 = por %p2712_p4, %p2711_p3 }
 0x3d9   : > { %2214 = vmatpush.msrb.mxu2 %v2172_v43 }
 0x3da   : > { %2264 = vmatpush.msra.mxu1 %v2254_v54  ;;  %p2714_p8 = pnand %p2713_p7, %p2709_p2 }
 0x3db   : > { %2215 = vmatpush.msrb.mxu2 %v2171_v45 }
 0x3dc   : > { %2265 = vmatpush.msra.mxu1 %v2253_v55 }
 0x3dd   : > { %2216 = vmatpush.msrb.mxu2 %v2170_v47 }
 0x3de   : > { %2266 = vmatpush.msra.mxu1 %v2252_v56 }
 0x3df   : > { %2217 = vmatpush.msrb.mxu2 %v2169_v49 }
 0x3e0   : > { %2267 = vmatpush.msra.mxu1 %v2251_v57 }
 0x3e2   : > { %2268 = vmatpush.msra.mxu1 %v2250_v7 }
 0x3e4   : > { %2269 = vmatpush.msra.mxu1 %v2249_v8 }
 0x3e6   : > { %2270 = vmatpush.msra.mxu1 %v2248_v9 }
 0x3e8   : > { %2271 = vmatpush.msra.mxu1 %v2247_v10 }
 0x3ea   : > { %2272 = vmatpush.msra.mxu1 %v2246_v11 }
 0x3ec   : > { %2273 = vmatpush.msra.mxu1 %v2245_v12 }
 0x3ee   : > { %2274 = vmatpush.msra.mxu1 %v2244_v13 }
 0x3f0   : > { %2275 = vmatpush.msra.mxu1 %v2243_v14 }
 0x423   : > { %v1867_v21 = vpop.f32.mrf.mxu1  ;;  %v1967_v25 = vpop.f32.mrf.mxu0 }
 0x430   : > { %v1887_v24 = vpop.f32.mrf.mxu2 }
 0x431   : > { %v1888_v27 = vadd.f32 %v1887_v24, %v1867_v21  ;;  %v2259_v21 = vld [vmem:[%s4148_s4] sm:$0x1] }
 0x436   : > { %v2007_v29 = vpop.f32.mrf.mxu1 }
 0x43c   : > { %v1907_v22 = vpop.f32.mrf.mxu3 }
 0x43d   : > { %v1908_v30 = vadd.f32 %v1907_v22, %v1888_v27 }
 0x444   : > { %v1987_v26 = vpop.f32.mrf.mxu3 }
 0x445   : > { %v1988_v28 = vadd.f32 %v1987_v26, %v1967_v25 }
 0x447   : > { %v2008_v31 = vadd.f32 %v2007_v29, %v1988_v28 }
 0x449   : > { %v2010_v32 = vmax.f32 %v1908_v30, %v2008_v31 }
 0x44b   : > { %v2011_v33 = vmax.f32 %v2010_v32, 0.0 }
 0x44d   : > { %2135 = vmatmul.f32.vlgmr.msrb.gmra.mxu1 %v2011_v33  ;;  %2155 = vmatmul.f32.vlgmr.msra.gmra.mxu3 %v2011_v33  ;;  %v2077_v34 = vrot.slane %v2011_v33, 1 }
 0x44f   : > { %2095 = vmatmul.f32.vlgmr.msra.gmra.mxu2 %v2077_v34  ;;  %2115 = vmatmul.f32.vlgmr.msra.gmra.mxu0 %v2077_v34 }
 0x4ca   : > { %v2136_v0 = vpop.f32.mrf.mxu1 }
 0x4cc   : > { %v2116_v60 = vpop.f32.mrf.mxu0 }
 0x4d0   : > { %v2156_v61 = vpop.f32.mrf.mxu3 }
 0x4d1   : > { %v2157_v62 = vadd.f32 %v2156_v61, %v2116_v60 }
 0x4d2   : > { %v2096_v1 = vpop.f32.mrf.mxu2 }
 0x4d3   : > { %v2166_v2 = vadd.f32 %v2162_v59, %v2157_v62  ;;  %v2137_v3 = vadd.f32 %v2136_v0, %v2096_v1 }
 0x4d5   : > { %v2168_v4 = vmax.f32 %v2166_v2, 0.0  ;;  %v2165_v5 = vadd.f32 %v2161_v63, %v2137_v3 }
 0x4d7   : > { %v2167_v6 = vmax.f32 %v2165_v5, 0.0  ;;  %2238 = vmatmul.f32.vlgmr.msrb.gmra.mxu0 %v2168_v4 }
 0x4d9   : > { %2218 = vmatmul.f32.vlgmr.msrb.gmra.mxu2 %v2167_v6 }
 0x554   : > { %v2239_v18 = vpop.f32.mrf.mxu0 }
 0x55c   : > { %v2219_v16 = vpop.f32.mrf.mxu2 }
 0x55d   : > { %v2220_v17 = vadd.f32 %v2219_v16, %v2201_v15 }
 0x55f   : > { %v2240_v19 = vadd.f32 %v2239_v18, %v2220_v17 }
 0x561   : > { %v2242_v20 = vmax.f32 %v2240_v19, 0.0 }
 0x563   : > { %2276 = vmatmul.f32.vlgmr.msra.gmra.mxu1 %v2242_v20 }
 0x5e0   : > { %v2277_v22 = vpop.f32.mrf.mxu1 }
 0x5e1   : > { %v2278_v23 = vadd.f32 %v2277_v22, %v2259_v21 }
 0x5e3   : > { %v2281_v24 = vsel %vm2280_vm11, %v2278_v23, -inf }
 0x5e4   : > { %2282 = vmax.xlane.f32.xlu0 %v2281_v24 }
 0x657   : > { %v2283_v25 = vpop.xlane.xlu0 %2282 }
 0x658   : > { %v2284_v26 = vsub.f32 %v2278_v23, %v2283_v25 }
 0x65a   : > { %v2285_v27 = vmul.f32 1.442695, %v2284_v26 }
 0x65c   : > { %2566 = vpow2.f32 %v2285_v27 }
 0x662   : > { %v2567_v28 = vpop.eup %2566 }
 0x663   : > { %v2287_v29 = vsel %vm2280_vm11, %v2567_v28, 0.0 }
 0x664   : > { %2288 = vadd.xlane.f32.xlu0 %v2287_v29 }
 0x6d7   : > { %v2289_v30 = vpop.xlane.xlu0 %2288 }
 0x6d8   : > { %2568 = vrcp.f32 %v2289_v30  ;;  %v2301_v34 = vand.u32 2147483648, %v2289_v30  ;;  %v2299_v36 = vand.u32 2147483647, %v2289_v30  ;;  %vm2295_vm13 = vweird.f32 %v2289_v30 }
 0x6da   : > { %v2302_v38 = vor.u32 1.1754944e-38, %v2301_v34  ;;  %vm2300_vm15 = vcmp.eq.f32.partialorder %v2299_v36, 8.507059e+37 }
 0x6de   : > { %v2569_v31 = vpop.eup %2568 }
 0x6df   : > { %v2291_v32 = vmul.f32 %v2569_v31, %v2289_v30  ;;  %vm2296_vm12 = vweird.f32 %v2569_v31 }
 0x6e0   : > { %vm2297_vm14 = vmor %vm2295_vm13, %vm2296_vm12 }
 0x6e1   : > { %v2292_v33 = vsub.f32 1.0, %v2291_v32 }
 0x6e3   : > { %v2293_v35 = vmul.f32 %v2569_v31, %v2292_v33 }
 0x6e5   : > { %v2294_v37 = vadd.f32 %v2569_v31, %v2293_v35 }
 0x6e7   : > { %v2298_v39 = vsel %vm2297_vm14, %v2569_v31, %v2294_v37 }
 0x6e8   : > { %v2303_v40 = vsel %vm2300_vm15, %v2302_v38, %v2298_v39 }
 0x6e9   : > { %v2304_v41 = vmul.f32 %v2567_v28, %v2303_v40 }
 0x6eb   : > { %2305 = vst.msk [vmem:[%s850_s1] sm:$0x1] %vm2280_vm11, %v2304_v41 }
 0x6ec   : > { %2717 = shalt.err (!%p2714_p8)
}
 0x6ed   : > { %2497 = dma.vmem_to_hbm [thread:$0]  (%p2947_p5), %s2318_s9, 16, %s2320_s5, %s2307_s27  }
 0x6ee PF: > { %s4153_s23 = sld [smem:[#allocation18_spill]] }
 0x6ef   : > { %s4154_s7 = sld [smem:[#allocation15_spill]] }
 0x6f4   : > { %p2524_p9 = scmp.ge.s32.totalorder %s4153_s23, 2 }
 0x6f5   : > { %s2331_s1 = sand.u32 1, %s4154_s7  }
 0x6f6   : > { %p2513_p10 = pnand %p2524_p9, %p2951_p6  ;;  %s2332_s0 = scalar_lea.sflag [#allocation4], %s2331_s1 }
 0x6f8   : > { %p2514_p11 = pneg %p2513_p10 }
 0x6fa   : > { %2747 = dma.done.wait (%p2514_p11), %s2332_s0, 16  }
 0x6fb   : > { %2749 = vsyncadd (%p2514_p11), %s2332_s0, 4294967280  ;;  %s4156_s28 = sld [smem:[#allocation19_spill]] }
 0x6fc   : > { %s4157_s27 = sld [smem:[#allocation16_spill]] }
 0x6fd   : > { %s4158_s3 = sld [smem:[#allocation17_spill]] }
 0x6fe   : > { %s4159_s7 = sld [smem:[#allocation20_spill]] }
 0x701   : > { %p39_p12 = scmp.ge.s32.totalorder %s4156_s28, 4  }
 0x703   :  { %41 = sbr.rel (!%p39_p12) target bundleno = 23 (0x17), region = 176 }
 0x708   :  { %2337 = vsyncpa [#allocation3], 1 }
 0x709   :  { %2339 = vsyncpa [#allocation3 + $0x1], 1 }
 0x70a   :  { %2340 = vsyncpa [#allocation6], 1 }
 0x70b   :  { %2341 = vsyncpa [#allocation9], 1 }
 0x70c   :  { %2342 = vsyncpa [#allocation4], 1 }
 0x70d   :  { %2344 = vsyncpa [#allocation4 + $0x1], 1 }

</bundles_post_ra>
